<compile_context>
chip_gen: v5e
topology: v5e:2x2
jax: 0.10.0
libtpu: 0.0.40
codegen_flags: <defaults>
</compile_context>

<pallas_src>
import functools

import jax
import jax.numpy as jnp
from jax.experimental import pallas as pl
from jax.experimental.pallas import tpu as pltpu


# ----------------------------------------------------------------------------
# Generation-aware tiling / compiler parameters
# ----------------------------------------------------------------------------
def _vmem_capacity_bytes():
    try:
        return int(pltpu.get_tpu_info().vmem_capacity_bytes)
    except Exception:                       # noqa: BLE001 - conservative fallback
        return 64 * 1024 * 1024             # v7x per-core VMEM (smallest gen)


_VMEM_CAP = _vmem_capacity_bytes()
# Scoped-VMEM limit: ~3/4 of physical (48 MiB on v7x, 96 MiB on v5e/v6e).
_VMEM_LIMIT = int(min((3 * _VMEM_CAP) // 4, 100 * 1024 * 1024))
# Per-block byte budgets (blocks are double-buffered by the pipeline).
_READ_BLOCK_BYTES = int(min(_VMEM_CAP // 5, 14 * 1024 * 1024))   # read-only stream
_RW_BLOCK_BYTES = int(min(_VMEM_CAP // 9, 8 * 1024 * 1024))      # read+write stream


def _cparams(*sem):
    return pltpu.CompilerParams(dimension_semantics=sem,
                                vmem_limit_bytes=_VMEM_LIMIT)


def _row_tile(hh, wcp, elem_bytes, bytes_per_block, min_rows):
    """Rows (of half-resolution image) per block: divides hh, multiple of
    min_rows (8 f32 / 16 bf16) or == hh, sized by the per-block byte budget."""
    rows = max(min_rows, bytes_per_block // max(1, 4 * wcp * elem_bytes))
    if hh <= rows:
        return hh
    t = (rows // min_rows) * min_rows
    while t >= min_rows:
        if hh % t == 0:
            return t
        t -= min_rows
    # TODO(synk): masked tail tile for Hh with no multiple-of-min_rows divisor;
    # a single full-height block can exceed VMEM for very large images.
    return hh


# ----------------------------------------------------------------------------
# Kernel bodies
# ----------------------------------------------------------------------------
def _subbands(x1, x2, x3, x4):
    """Un-scaled DWT subbands (LL, HL, LH, HH); 8 adds instead of 12."""
    s12, s34 = x1 + x2, x3 + x4
    d12, d34 = x2 - x1, x4 - x3
    return s12 + s34, s34 - s12, d12 + d34, d34 - d12


def _dwt_pool_kernel(x_ref, pooled_ref):
    """DWT subbands + partial sum/max pooling for one (batch, split, H-tile).
    Subbands are NOT scaled by 0.5 here; the 0.5 is applied on the tiny pooled
    tensor in the wrapper (valid for max since 0.5 > 0)."""
    t = pl.program_id(2)
    x1 = x_ref[0, 0, 0].astype(jnp.float32)   # row even, col even
    x2 = x_ref[0, 1, 0].astype(jnp.float32)   # row odd,  col even
    x3 = x_ref[0, 0, 1].astype(jnp.float32)   # row even, col odd
    x4 = x_ref[0, 1, 1].astype(jnp.float32)   # row odd,  col odd
    sb = _subbands(x1, x2, x3, x4)
    sums = jnp.concatenate([jnp.sum(v, axis=0, keepdims=True) for v in sb], axis=0)
    maxs = jnp.concatenate([jnp.max(v, axis=0, keepdims=True) for v in sb], axis=0)

    @pl.when(t == 0)
    def _():
        pooled_ref[0, 0, 0] = sums
        pooled_ref[0, 0, 1] = maxs

    @pl.when(t > 0)
    def _():
        pooled_ref[0, 0, 0] = pooled_ref[0, 0, 0] + sums
        pooled_ref[0, 0, 1] = jnp.maximum(pooled_ref[0, 0, 1], maxs)


def _iwt_gate_kernel(x_ref, g_ref, o_ref):
    """Fused: x_wa = x*gate_wa; subbands(x_wa)*gate2 -> IWT -> sigmoid -> *x_wa.
    gate rows 1..4 carry 0.125*y2 (DWT 0.5, IWT 0.5 and the tanh-sigmoid 0.5
    all pre-folded), so the tanh argument is exactly h/2."""
    gwa = g_ref[0, 0:1]                       # (1, WCp) per-channel WALayer gate
    ga = g_ref[0, 1:2]                        # 0.125 * LL gate
    gb = g_ref[0, 2:3]                        # 0.125 * HL gate
    gc = g_ref[0, 3:4]                        # 0.125 * LH gate
    gd = g_ref[0, 4:5]                        # 0.125 * HH gate

    xw1 = x_ref[0, 0, 0].astype(jnp.float32) * gwa
    xw2 = x_ref[0, 1, 0].astype(jnp.float32) * gwa
    xw3 = x_ref[0, 0, 1].astype(jnp.float32) * gwa
    xw4 = x_ref[0, 1, 1].astype(jnp.float32) * gwa

    ll, hl, lh, hh = _subbands(xw1, xw2, xw3, xw4)
    a, b, c, d = ll * ga, hl * gb, lh * gc, hh * gd

    def gated(xw, half_h):                    # xw * sigmoid(h), 1 EUP op
        return (xw * (0.5 * (jnp.tanh(half_h) + 1.0))).astype(o_ref.dtype)

    o_ref[0, 0, 0] = gated(xw1, a - b - c + d)    # h[0::2, 0::2]
    o_ref[0, 1, 0] = gated(xw2, a - b + c - d)    # h[1::2, 0::2]
    o_ref[0, 0, 1] = gated(xw3, a + b - c - d)    # h[0::2, 1::2]
    o_ref[0, 1, 1] = gated(xw4, a + b + c + d)    # h[1::2, 1::2]


def _se_mlp_kernel(avg_ref, max_ref,
                   w1a_ref, b1a_ref, w2a_ref, b2a_ref,
                   w1m_ref, b1m_ref, w2m_ref, b2m_ref, out_ref):
    """sigmoid(conv2(relu(conv1(avg)))) + sigmoid(conv2'(relu(conv1'(max)))).
    1x1 convs on (B, 4C, 1, 1) == tiny dense matmuls; both branches, one launch."""
    def branch(v, w1, b1, w2, b2):
        h = jnp.maximum(jnp.dot(v, w1, preferred_element_type=jnp.float32) + b1, 0.0)
        return jax.nn.sigmoid(jnp.dot(h, w2, preferred_element_type=jnp.float32) + b2)

    out_ref[...] = (
        branch(avg_ref[...], w1a_ref[...], b1a_ref[...], w2a_ref[...], b2a_ref[...])
        + branch(max_ref[...], w1m_ref[...], b1m_ref[...], w2m_ref[...], b2m_ref[...]))


# ----------------------------------------------------------------------------
# pallas_call wrappers
# ----------------------------------------------------------------------------
def dwt_pool(xs):
    """Un-scaled DWT subbands of xs + per-lane sum/max pooling, accumulated
    over H tiles.  Returns (B, NS, 2, 4, WCp) f32 with [:, :, 0]=sums,
    [:, :, 1]=maxes (NS = H-range split for v7x dual-TensorCore use)."""
    B, _, _, Hh, WCp = xs.shape
    ebytes = jnp.dtype(xs.dtype).itemsize
    min_rows = 16 if ebytes < 4 else 8
    th = _row_tile(Hh, WCp, ebytes, _READ_BLOCK_BYTES, min_rows)
    nt = Hh // th
    ns = 2 if (nt % 2 == 0 and nt >= 2) else 1       # split H across both TCs
    tps = nt // ns
    return pl.pallas_call(
        _dwt_pool_kernel,
        out_shape=jax.ShapeDtypeStruct((B, ns, 2, 4, WCp), jnp.float32),
        grid=(B, ns, tps),
        in_specs=[pl.BlockSpec((1, 2, 2, th, WCp),
                               lambda b, s, t: (b, 0, 0, s * tps + t, 0))],
        out_specs=pl.BlockSpec((1, 1, 2, 4, WCp), lambda b, s, t: (b, s, 0, 0, 0)),
        compiler_params=_cparams("parallel", "parallel", "arbitrary"),
    )(xs)


def iwt_gate(xs, gates):
    """Fused gate/DWT/IWT/sigmoid/multiply pass; output stays in the
    parity-split layout (the wrapper interleaves once)."""
    B, _, _, Hh, WCp = xs.shape
    ebytes = jnp.dtype(xs.dtype).itemsize
    min_rows = 16 if ebytes < 4 else 8
    th = _row_tile(Hh, WCp, ebytes, _RW_BLOCK_BYTES, min_rows)
    return pl.pallas_call(
        _iwt_gate_kernel,
        out_shape=jax.ShapeDtypeStruct(xs.shape, xs.dtype),
        grid=(B, Hh // th),
        in_specs=[pl.BlockSpec((1, 2, 2, th, WCp), lambda b, t: (b, 0, 0, t, 0)),
                  pl.BlockSpec((1, 5, WCp), lambda b, t: (b, 0, 0))],
        out_specs=pl.BlockSpec((1, 2, 2, th, WCp), lambda b, t: (b, 0, 0, t, 0)),
        compiler_params=_cparams("parallel", "parallel"),
    )(xs, gates)


def se_mlp(avg, mx, p):
    B = avg.shape[0]
    cout = p["w2a"].shape[1]
    return pl.pallas_call(
        _se_mlp_kernel,
        out_shape=jax.ShapeDtypeStruct((B, cout), jnp.float32),
    )(avg, mx,
      p["w1a"], p["b1a"], p["w2a"], p["b2a"],
      p["w1m"], p["b1m"], p["w2m"], p["b2m"])


# ----------------------------------------------------------------------------
# Parameters (deterministic synthetic init; torch Conv2d(k=1) == dense matrix)
# ----------------------------------------------------------------------------
def init_params(key, channel, reduction=16):
    c4 = 4 * channel
    m = c4 // reduction if (c4 // reduction) != 0 else 1
    keys = jax.random.split(key, 16)

    def w(k, shape, scale=0.2):
        return (scale * jax.random.normal(k, shape)).astype(jnp.float32)

    def branch_pair(ks, cout):
        return {"w1a": w(ks[0], (c4, m)), "b1a": w(ks[1], (1, m)),
                "w2a": w(ks[2], (m, cout)), "b2a": w(ks[3], (1, cout)),
                "w1m": w(ks[4], (c4, m)), "b1m": w(ks[5], (1, m)),
                "w2m": w(ks[6], (m, cout)), "b2m": w(ks[7], (1, cout))}

    return {"wa": branch_pair(keys[:8], channel),      # WALayer: 4C -> m -> C
            "wgb": branch_pair(keys[8:], c4)}          # WGB:     4C -> m -> 4C


# ----------------------------------------------------------------------------
# Full WGB forward (wrapper glue around the kernels)
# ----------------------------------------------------------------------------
def _pooled_to_vectors(pooled, Hh, Wh, C, WC):
    """(B, NS, 2, 4, WCp) per-lane partial sums/maxes -> (B, 4C) avg/max
    vectors of the *reference* DWT (the hoisted 0.5 is applied here)."""
    B, NS = pooled.shape[0], pooled.shape[1]
    p = pooled[..., :WC].reshape(B, NS, 2, 4, Wh, C)
    avg = (p[:, :, 0].sum(axis=(1, 3)) * (0.5 / float(Hh * Wh))).reshape(B, 4 * C)
    mx = (p[:, :, 1].max(axis=(1, 3)) * 0.5).reshape(B, 4 * C)
    return avg, mx


@functools.partial(jax.jit, static_argnames=("stream_dtype",))
def wgb_forward(x_nchw, params, stream_dtype=jnp.float32):
    x = x_nchw.astype(jnp.float32)
    B, C, H, W = x.shape
    Hd, Wd = H % 2, W % 2
    if Hd or Wd:
        # Zero pad to even H/W exactly like the torch module (the pad rows/cols
        # legitimately enter the DWT pooling, so it must stay zero padding).
        x = jnp.pad(x, ((0, 0), (0, 0), (0, Hd), (0, Wd)))
    Hh, Wh = (H + Hd) // 2, (W + Wd) // 2
    WC = Wh * C
    WCp = ((WC + 127) // 128) * 128          # lane-dense: unmasked vreg stores

    # NCHW -> parity-split, lane-dense internal layout (one fused XLA pass).
    xs = (x.reshape(B, C, Hh, 2, Wh, 2)
            .transpose(0, 3, 5, 2, 4, 1)
            .reshape(B, 2, 2, Hh, WC))
    if WCp != WC:
        xs = jnp.pad(xs, ((0, 0), (0, 0), (0, 0), (0, 0), (0, WCp - WC)))
    xs = xs.astype(stream_dtype)

    # ---- pass 1: DWT + pooling of x (single image read) ----
    pooled1 = dwt_pool(xs)
    avg1, mx1 = _pooled_to_vectors(pooled1, Hh, Wh, C, WC)

    # ---- WALayer gate ----
    y_wa = se_mlp(avg1, mx1, params["wa"])                     # (B, C), in (0, 2)

    # Second DWT+pool pass eliminated: y_wa > 0 and the DWT is linear per
    # channel, so pooled(x * y_wa) == y_wa * pooled(x) exactly (zero pad incl.).
    y_wa4 = jnp.tile(y_wa, (1, 4))                             # (B, 4C)
    avg2, mx2 = avg1 * y_wa4, mx1 * y_wa4
    y2 = se_mlp(avg2, mx2, params["wgb"])                      # (B, 4C)

    # Gate tensor for the fused IWT kernel: row 0 = per-channel WA gate,
    # rows 1..4 = 0.125 * subband gates (DWT 0.5, IWT 0.5 and sigmoid's 0.5
    # folded in), all tiled over Wh to match the lane layout. Kept in f32.
    g_wa = jnp.tile(y_wa[:, None, :], (1, Wh, 1)).reshape(B, 1, WC)
    g_2 = jnp.tile((0.125 * y2).reshape(B, 4, 1, C), (1, 1, Wh, 1)).reshape(B, 4, WC)
    gates = jnp.concatenate([g_wa, g_2], axis=1)               # (B, 5, WC) f32
    if WCp != WC:
        gates = jnp.pad(gates, ((0, 0), (0, 0), (0, WCp - WC)))

    # ---- pass 2: gate + DWT + IWT + sigmoid + multiply, one read+write ----
    outs = iwt_gate(xs, gates)                                 # (B,2,2,Hh,WCp)

    # Parity interleave + crop + back to NCHW (one fused XLA pass).
    out = (outs[..., :WC].astype(jnp.float32)
               .reshape(B, 2, 2, Hh, Wh, C)
               .transpose(0, 5, 3, 1, 4, 2)
               .reshape(B, C, 2 * Hh, 2 * Wh))
    return out[:, :, :H, :W]


# ----------------------------------------------------------------------------
# Pure-JAX reference (mirrors the torch module, NHWC internally)
# ----------------------------------------------------------------------------
def _dwt_ref(x):
    x1 = x[:, 0::2, 0::2, :] / 2
    x2 = x[:, 1::2, 0::2, :] / 2
    x3 = x[:, 0::2, 1::2, :] / 2
    x4 = x[:, 1::2, 1::2, :] / 2
    return jnp.concatenate([x1 + x2 + x3 + x4, -x1 - x2 + x3 + x4,
                            -x1 + x2 - x3 + x4, x1 - x2 - x3 + x4], axis=-1)


def _iwt_ref(x):
    B, h, w, c4 = x.shape
    c = c4 // 4
    x1, x2, x3, x4 = (x[..., 0:c] / 2, x[..., c:2 * c] / 2,
                      x[..., 2 * c:3 * c] / 2, x[..., 3 * c:] / 2)
    out = jnp.zeros((B, 2 * h, 2 * w, c), x.dtype)
    out = out.at[:, 0::2, 0::2, :].set(x1 - x2 - x3 + x4)
    out = out.at[:, 1::2, 0::2, :].set(x1 - x2 + x3 - x4)
    out = out.at[:, 0::2, 1::2, :].set(x1 + x2 - x3 - x4)
    out = out.at[:, 1::2, 1::2, :].set(x1 + x2 + x3 + x4)
    return out


def _mlp_ref(p, v_avg, v_max):
    def branch(v, w1, b1, w2, b2):
        return jax.nn.sigmoid(jnp.maximum(v @ w1 + b1, 0.0) @ w2 + b2)
    return (branch(v_avg, p["w1a"], p["b1a"], p["w2a"], p["b2a"])
            + branch(v_max, p["w1m"], p["b1m"], p["w2m"], p["b2m"]))


def wgb_ref(x_nchw, params):
    x = jnp.transpose(x_nchw, (0, 2, 3, 1)).astype(jnp.float32)
    B, H, W, C = x.shape
    Hd, Wd = H % 2, W % 2
    xp = jnp.pad(x, ((0, 0), (0, Hd), (0, Wd), (0, 0)))
    d = _dwt_ref(xp)
    y_wa = _mlp_ref(params["wa"], d.mean(axis=(1, 2)), d.max(axis=(1, 2)))
    x_wa = x * y_wa[:, None, None, :]
    xp2 = jnp.pad(x_wa, ((0, 0), (0, Hd), (0, Wd), (0, 0)))
    d2 = _dwt_ref(xp2)
    y2 = _mlp_ref(params["wgb"], d2.mean(axis=(1, 2)), d2.max(axis=(1, 2)))
    mp = _iwt_ref(d2 * y2[:, None, None, :])[:, :H, :W, :]
    out = x_wa * jax.nn.sigmoid(mp)
    return jnp.transpose(out, (0, 3, 1, 2))


# ----------------------------------------------------------------------------
if __name__ == "__main__":
    key = jax.random.PRNGKey(0)
    kx, kp, kx2 = jax.random.split(key, 3)

    B, C, H, W = 2, 4, 16, 16
    x = jax.random.normal(kx, (B, C, H, W), dtype=jnp.float32)
    params = init_params(kp, C, reduction=16)
    ref = jax.block_until_ready(wgb_ref(x, params))

    # f32 streaming path
    out = jax.block_until_ready(wgb_forward(x, params))
    assert out.shape == (B, C, H, W), out.shape
    assert bool(jnp.all(jnp.isfinite(out)))
    assert jnp.allclose(out, ref, rtol=1e-3, atol=1e-3), (
        float(jnp.max(jnp.abs(out - ref))))

    # odd spatial size exercises the zero-pad + crop path of the module
    x_odd = jax.random.normal(kx2, (2, C, 15, 13), dtype=jnp.float32)
    out_odd = jax.block_until_ready(wgb_forward(x_odd, params))
    ref_odd = jax.block_until_ready(wgb_ref(x_odd, params))
    assert out_odd.shape == (2, C, 15, 13), out_odd.shape
    assert jnp.allclose(out_odd, ref_odd, rtol=1e-3, atol=1e-3), (
        float(jnp.max(jnp.abs(out_odd - ref_odd))))

    # bf16 streaming path (image tensors bf16; pooled stats / SE-MLP stay f32)
    out_bf16 = jax.block_until_ready(
        wgb_forward(x, params, stream_dtype=jnp.bfloat16))
    assert out_bf16.shape == (B, C, H, W), out_bf16.shape
    assert bool(jnp.all(jnp.isfinite(out_bf16)))
    assert jnp.allclose(out_bf16, ref, rtol=6e-2, atol=6e-2), (
        float(jnp.max(jnp.abs(out_bf16 - ref))))

    print("KERNEL_OK")
</pallas_src>

<mosaic_0001>
module attributes {stable_mosaic.version = 11 : i64} {
  func.func @_dwt_pool_kernel(%arg0: i32, %arg1: i32, %arg2: i32, %arg3: memref<1x2x2x8x128xf32, #tpu.memory_space<vmem>>, %arg4: memref<1x1x2x4x128xf32, #tpu.memory_space<vmem>>) attributes {dimension_semantics = [#tpu.dimension_semantics<parallel>, #tpu.dimension_semantics<parallel>, #tpu.dimension_semantics<arbitrary>], iteration_bounds = array<i64: 2, 1, 1>, scalar_prefetch = 0 : i64, scratch_operands = 0 : i64, tpu.core_type = #tpu.core_type<tc>, window_params = [{transform_indices = @transform_0, window_bounds = array<i64: 1, 2, 2, 8, 128>}, {transform_indices = @transform_1, window_bounds = array<i64: 1, 1, 2, 4, 128>}]} {
    %c0 = arith.constant 0 : index
    %c0_0 = arith.constant 0 : index
    %c0_1 = arith.constant 0 : index
    %c0_2 = arith.constant 0 : index
    %c0_3 = arith.constant 0 : index
    %0 = vector.load %arg3[%c0, %c0_0, %c0_1, %c0_2, %c0_3] : memref<1x2x2x8x128xf32, #tpu.memory_space<vmem>>, vector<1x1x1x8x128xf32>
    %1 = vector.shape_cast %0 : vector<1x1x1x8x128xf32> to vector<8x128xf32>
    %c0_4 = arith.constant 0 : index
    %c1 = arith.constant 1 : index
    %c0_5 = arith.constant 0 : index
    %c0_6 = arith.constant 0 : index
    %c0_7 = arith.constant 0 : index
    %2 = vector.load %arg3[%c0_4, %c1, %c0_5, %c0_6, %c0_7] : memref<1x2x2x8x128xf32, #tpu.memory_space<vmem>>, vector<1x1x1x8x128xf32>
    %3 = vector.shape_cast %2 : vector<1x1x1x8x128xf32> to vector<8x128xf32>
    %c0_8 = arith.constant 0 : index
    %c0_9 = arith.constant 0 : index
    %c1_10 = arith.constant 1 : index
    %c0_11 = arith.constant 0 : index
    %c0_12 = arith.constant 0 : index
    %4 = vector.load %arg3[%c0_8, %c0_9, %c1_10, %c0_11, %c0_12] : memref<1x2x2x8x128xf32, #tpu.memory_space<vmem>>, vector<1x1x1x8x128xf32>
    %5 = vector.shape_cast %4 : vector<1x1x1x8x128xf32> to vector<8x128xf32>
    %c0_13 = arith.constant 0 : index
    %c1_14 = arith.constant 1 : index
    %c1_15 = arith.constant 1 : index
    %c0_16 = arith.constant 0 : index
    %c0_17 = arith.constant 0 : index
    %6 = vector.load %arg3[%c0_13, %c1_14, %c1_15, %c0_16, %c0_17] : memref<1x2x2x8x128xf32, #tpu.memory_space<vmem>>, vector<1x1x1x8x128xf32>
    %7 = vector.shape_cast %6 : vector<1x1x1x8x128xf32> to vector<8x128xf32>
    %8 = arith.addf %1, %3 : vector<8x128xf32>
    %9 = arith.addf %5, %7 : vector<8x128xf32>
    %10 = arith.subf %3, %1 : vector<8x128xf32>
    %11 = arith.subf %7, %5 : vector<8x128xf32>
    %12 = arith.addf %8, %9 : vector<8x128xf32>
    %13 = arith.subf %9, %8 : vector<8x128xf32>
    %14 = arith.addf %10, %11 : vector<8x128xf32>
    %15 = arith.subf %11, %10 : vector<8x128xf32>
    %cst = arith.constant dense<0.000000e+00> : vector<128xf32>
    %16 = vector.multi_reduction <add>, %12, %cst [0] : vector<8x128xf32> to vector<128xf32>
    %17 = vector.shape_cast %16 : vector<128xf32> to vector<1x128xf32>
    %cst_18 = arith.constant dense<0.000000e+00> : vector<128xf32>
    %18 = vector.multi_reduction <add>, %13, %cst_18 [0] : vector<8x128xf32> to vector<128xf32>
    %19 = vector.shape_cast %18 : vector<128xf32> to vector<1x128xf32>
    %cst_19 = arith.constant dense<0.000000e+00> : vector<128xf32>
    %20 = vector.multi_reduction <add>, %14, %cst_19 [0] : vector<8x128xf32> to vector<128xf32>
    %21 = vector.shape_cast %20 : vector<128xf32> to vector<1x128xf32>
    %cst_20 = arith.constant dense<0.000000e+00> : vector<128xf32>
    %22 = vector.multi_reduction <add>, %15, %cst_20 [0] : vector<8x128xf32> to vector<128xf32>
    %23 = vector.shape_cast %22 : vector<128xf32> to vector<1x128xf32>
    %24 = tpu.concatenate %17, %19, %21, %23 in 0 : vector<1x128xf32>, vector<1x128xf32>, vector<1x128xf32>, vector<1x128xf32> -> vector<4x128xf32>
    %cst_21 = arith.constant dense<0xFF800000> : vector<128xf32>
    %25 = vector.multi_reduction <maximumf>, %12, %cst_21 [0] : vector<8x128xf32> to vector<128xf32>
    %26 = vector.shape_cast %25 : vector<128xf32> to vector<1x128xf32>
    %cst_22 = arith.constant dense<0xFF800000> : vector<128xf32>
    %27 = vector.multi_reduction <maximumf>, %13, %cst_22 [0] : vector<8x128xf32> to vector<128xf32>
    %28 = vector.shape_cast %27 : vector<128xf32> to vector<1x128xf32>
    %cst_23 = arith.constant dense<0xFF800000> : vector<128xf32>
    %29 = vector.multi_reduction <maximumf>, %14, %cst_23 [0] : vector<8x128xf32> to vector<128xf32>
    %30 = vector.shape_cast %29 : vector<128xf32> to vector<1x128xf32>
    %cst_24 = arith.constant dense<0xFF800000> : vector<128xf32>
    %31 = vector.multi_reduction <maximumf>, %15, %cst_24 [0] : vector<8x128xf32> to vector<128xf32>
    %32 = vector.shape_cast %31 : vector<128xf32> to vector<1x128xf32>
    %33 = tpu.concatenate %26, %28, %30, %32 in 0 : vector<1x128xf32>, vector<1x128xf32>, vector<1x128xf32>, vector<1x128xf32> -> vector<4x128xf32>
    %c0_i32 = arith.constant 0 : i32
    %34 = arith.cmpi eq, %arg2, %c0_i32 : i32
    %35 = arith.extui %34 : i1 to i32
    %c0_i32_25 = arith.constant 0 : i32
    %36 = arith.cmpi ne, %35, %c0_i32_25 : i32
    scf.if %36 {
      %c0_28 = arith.constant 0 : index
      %c0_29 = arith.constant 0 : index
      %c0_30 = arith.constant 0 : index
      %c0_31 = arith.constant 0 : index
      %c0_32 = arith.constant 0 : index
      %40 = vector.load %arg4[%c0_28, %c0_29, %c0_30, %c0_31, %c0_32] : memref<1x1x2x4x128xf32, #tpu.memory_space<vmem>>, vector<1x1x1x4x128xf32>
      %41 = vector.shape_cast %40 : vector<1x1x1x4x128xf32> to vector<4x128xf32>
      %42 = vector.shape_cast %24 : vector<4x128xf32> to vector<1x1x1x4x128xf32>
      tpu.vector_store %arg4[%c0_28, %c0_29, %c0_30, %c0_31, %c0_32], %42 {strides = array<i32>} : memref<1x1x2x4x128xf32, #tpu.memory_space<vmem>>, vector<1x1x1x4x128xf32>,
      %c0_33 = arith.constant 0 : index
      %c0_34 = arith.constant 0 : index
      %c1_35 = arith.constant 1 : index
      %c0_36 = arith.constant 0 : index
      %c0_37 = arith.constant 0 : index
      %43 = vector.load %arg4[%c0_33, %c0_34, %c1_35, %c0_36, %c0_37] : memref<1x1x2x4x128xf32, #tpu.memory_space<vmem>>, vector<1x1x1x4x128xf32>
      %44 = vector.shape_cast %43 : vector<1x1x1x4x128xf32> to vector<4x128xf32>
      %45 = vector.shape_cast %33 : vector<4x128xf32> to vector<1x1x1x4x128xf32>
      tpu.vector_store %arg4[%c0_33, %c0_34, %c1_35, %c0_36, %c0_37], %45 {strides = array<i32>} : memref<1x1x2x4x128xf32, #tpu.memory_space<vmem>>, vector<1x1x1x4x128xf32>,
    } else {
    }
    %c0_i32_26 = arith.constant 0 : i32
    %37 = arith.cmpi sgt, %arg2, %c0_i32_26 : i32
    %38 = arith.extui %37 : i1 to i32
    %c0_i32_27 = arith.constant 0 : i32
    %39 = arith.cmpi ne, %38, %c0_i32_27 : i32
    scf.if %39 {
      %c0_28 = arith.constant 0 : index
      %c0_29 = arith.constant 0 : index
      %c0_30 = arith.constant 0 : index
      %c0_31 = arith.constant 0 : index
      %c0_32 = arith.constant 0 : index
      %40 = vector.load %arg4[%c0_28, %c0_29, %c0_30, %c0_31, %c0_32] : memref<1x1x2x4x128xf32, #tpu.memory_space<vmem>>, vector<1x1x1x4x128xf32>
      %41 = vector.shape_cast %40 : vector<1x1x1x4x128xf32> to vector<4x128xf32>
      %42 = arith.addf %41, %24 : vector<4x128xf32>
      %c0_33 = arith.constant 0 : index
      %c0_34 = arith.constant 0 : index
      %c0_35 = arith.constant 0 : index
      %c0_36 = arith.constant 0 : index
      %c0_37 = arith.constant 0 : index
      %43 = vector.load %arg4[%c0_33, %c0_34, %c0_35, %c0_36, %c0_37] : memref<1x1x2x4x128xf32, #tpu.memory_space<vmem>>, vector<1x1x1x4x128xf32>
      %44 = vector.shape_cast %43 : vector<1x1x1x4x128xf32> to vector<4x128xf32>
      %45 = vector.shape_cast %42 : vector<4x128xf32> to vector<1x1x1x4x128xf32>
      tpu.vector_store %arg4[%c0_33, %c0_34, %c0_35, %c0_36, %c0_37], %45 {strides = array<i32>} : memref<1x1x2x4x128xf32, #tpu.memory_space<vmem>>, vector<1x1x1x4x128xf32>,
      %c0_38 = arith.constant 0 : index
      %c0_39 = arith.constant 0 : index
      %c1_40 = arith.constant 1 : index
      %c0_41 = arith.constant 0 : index
      %c0_42 = arith.constant 0 : index
      %46 = vector.load %arg4[%c0_38, %c0_39, %c1_40, %c0_41, %c0_42] : memref<1x1x2x4x128xf32, #tpu.memory_space<vmem>>, vector<1x1x1x4x128xf32>
      %47 = vector.shape_cast %46 : vector<1x1x1x4x128xf32> to vector<4x128xf32>
      %48 = arith.maximumf %47, %33 : vector<4x128xf32>
      %c0_43 = arith.constant 0 : index
      %c0_44 = arith.constant 0 : index
      %c1_45 = arith.constant 1 : index
      %c0_46 = arith.constant 0 : index
      %c0_47 = arith.constant 0 : index
      %49 = vector.load %arg4[%c0_43, %c0_44, %c1_45, %c0_46, %c0_47] : memref<1x1x2x4x128xf32, #tpu.memory_space<vmem>>, vector<1x1x1x4x128xf32>
      %50 = vector.shape_cast %49 : vector<1x1x1x4x128xf32> to vector<4x128xf32>
      %51 = vector.shape_cast %48 : vector<4x128xf32> to vector<1x1x1x4x128xf32>
      tpu.vector_store %arg4[%c0_43, %c0_44, %c1_45, %c0_46, %c0_47], %51 {strides = array<i32>} : memref<1x1x2x4x128xf32, #tpu.memory_space<vmem>>, vector<1x1x1x4x128xf32>,
    } else {
    }
    return
  }
  func.func @transform_0(%arg0: i32, %arg1: i32, %arg2: i32) -> (i32, i32, i32, i32, i32) {
    %c1_i32 = arith.constant 1 : i32
    %0 = arith.muli %arg1, %c1_i32 : i32
    %1 = arith.addi %0, %arg2 : i32
    %c0_i32 = arith.constant 0 : i32
    %c0_i32_0 = arith.constant 0 : i32
    %c0_i32_1 = arith.constant 0 : i32
    %c0_i32_2 = arith.constant 0 : i32
    return %arg0, %c0_i32, %c0_i32_0, %1, %c0_i32_1 : i32, i32, i32, i32, i32
  }
  func.func @transform_1(%arg0: i32, %arg1: i32, %arg2: i32) -> (i32, i32, i32, i32, i32) {
    %c0_i32 = arith.constant 0 : i32
    %c0_i32_0 = arith.constant 0 : i32
    %c0_i32_1 = arith.constant 0 : i32
    %c0_i32_2 = arith.constant 0 : i32
    return %arg0, %arg1, %c0_i32, %c0_i32_0, %c0_i32_1 : i32, i32, i32, i32, i32
  }
}

module attributes {stable_mosaic.version = 11 : i64} {
  func.func @_se_mlp_kernel(%arg0: memref<2x16xf32, #tpu.memory_space<vmem>>, %arg1: memref<2x16xf32, #tpu.memory_space<vmem>>, %arg2: memref<16x1xf32, #tpu.memory_space<vmem>>, %arg3: memref<1x1xf32, #tpu.memory_space<vmem>>, %arg4: memref<1x4xf32, #tpu.memory_space<vmem>>, %arg5: memref<1x4xf32, #tpu.memory_space<vmem>>, %arg6: memref<16x1xf32, #tpu.memory_space<vmem>>, %arg7: memref<1x1xf32, #tpu.memory_space<vmem>>, %arg8: memref<1x4xf32, #tpu.memory_space<vmem>>, %arg9: memref<1x4xf32, #tpu.memory_space<vmem>>, %arg10: memref<2x4xf32, #tpu.memory_space<vmem>>) attributes {dimension_semantics = [], scalar_prefetch = 0 : i64, scratch_operands = 0 : i64, tpu.core_type = #tpu.core_type<tc>} {
    %c0 = arith.constant 0 : index
    %c0_0 = arith.constant 0 : index
    %0 = vector.load %arg0[%c0, %c0_0] : memref<2x16xf32, #tpu.memory_space<vmem>>, vector<2x16xf32>
    %c0_1 = arith.constant 0 : index
    %c0_2 = arith.constant 0 : index
    %1 = vector.load %arg2[%c0_1, %c0_2] : memref<16x1xf32, #tpu.memory_space<vmem>>, vector<16x1xf32>
    %c0_3 = arith.constant 0 : index
    %c0_4 = arith.constant 0 : index
    %2 = vector.load %arg3[%c0_3, %c0_4] : memref<1x1xf32, #tpu.memory_space<vmem>>, vector<1x1xf32>
    %c0_5 = arith.constant 0 : index
    %c0_6 = arith.constant 0 : index
    %3 = vector.load %arg4[%c0_5, %c0_6] : memref<1x4xf32, #tpu.memory_space<vmem>>, vector<1x4xf32>
    %c0_7 = arith.constant 0 : index
    %c0_8 = arith.constant 0 : index
    %4 = vector.load %arg5[%c0_7, %c0_8] : memref<1x4xf32, #tpu.memory_space<vmem>>, vector<1x4xf32>
    %cst = arith.constant dense<0.000000e+00> : vector<2x1xf32>
    %5 = tpu.matmul %0, %1, %cst {dimension_numbers = #tpu.dot_dimension_numbers<[1], [0], [0], [1], [0, 0, 1, 1], [], []>} : vector<2x16xf32>, vector<16x1xf32>, vector<2x1xf32> -> vector<2x1xf32>
    %6 = vector.broadcast %2 : vector<1x1xf32> to vector<2x1xf32>
    %7 = arith.addf %5, %6 : vector<2x1xf32>
    %cst_9 = arith.constant 0.000000e+00 : f32
    %8 = vector.broadcast %cst_9 : f32 to vector<2x1xf32>
    %9 = arith.maximumf %7, %8 : vector<2x1xf32>
    %cst_10 = arith.constant dense<0.000000e+00> : vector<2x4xf32>
    %10 = tpu.matmul %9, %3, %cst_10 {dimension_numbers = #tpu.dot_dimension_numbers<[1], [0], [0], [1], [0, 0, 1, 1], [], []>} : vector<2x1xf32>, vector<1x4xf32>, vector<2x4xf32> -> vector<2x4xf32>
    %11 = vector.broadcast %4 : vector<1x4xf32> to vector<2x4xf32>
    %12 = arith.addf %10, %11 : vector<2x4xf32>
    %13 = arith.negf %12 : vector<2x4xf32>
    %14 = math.exp %13 : vector<2x4xf32>
    %cst_11 = arith.constant 1.000000e+00 : f32
    %15 = vector.broadcast %cst_11 : f32 to vector<2x4xf32>
    %16 = arith.addf %15, %14 : vector<2x4xf32>
    %17 = arith.divf %15, %16 : vector<2x4xf32>
    %c0_12 = arith.constant 0 : index
    %c0_13 = arith.constant 0 : index
    %18 = vector.load %arg1[%c0_12, %c0_13] : memref<2x16xf32, #tpu.memory_space<vmem>>, vector<2x16xf32>
    %c0_14 = arith.constant 0 : index
    %c0_15 = arith.constant 0 : index
    %19 = vector.load %arg6[%c0_14, %c0_15] : memref<16x1xf32, #tpu.memory_space<vmem>>, vector<16x1xf32>
    %c0_16 = arith.constant 0 : index
    %c0_17 = arith.constant 0 : index
    %20 = vector.load %arg7[%c0_16, %c0_17] : memref<1x1xf32, #tpu.memory_space<vmem>>, vector<1x1xf32>
    %c0_18 = arith.constant 0 : index
    %c0_19 = arith.constant 0 : index
    %21 = vector.load %arg8[%c0_18, %c0_19] : memref<1x4xf32, #tpu.memory_space<vmem>>, vector<1x4xf32>
    %c0_20 = arith.constant 0 : index
    %c0_21 = arith.constant 0 : index
    %22 = vector.load %arg9[%c0_20, %c0_21] : memref<1x4xf32, #tpu.memory_space<vmem>>, vector<1x4xf32>
    %cst_22 = arith.constant dense<0.000000e+00> : vector<2x1xf32>
    %23 = tpu.matmul %18, %19, %cst_22 {dimension_numbers = #tpu.dot_dimension_numbers<[1], [0], [0], [1], [0, 0, 1, 1], [], []>} : vector<2x16xf32>, vector<16x1xf32>, vector<2x1xf32> -> vector<2x1xf32>
    %24 = vector.broadcast %20 : vector<1x1xf32> to vector<2x1xf32>
    %25 = arith.addf %23, %24 : vector<2x1xf32>
    %cst_23 = arith.constant 0.000000e+00 : f32
    %26 = vector.broadcast %cst_23 : f32 to vector<2x1xf32>
    %27 = arith.maximumf %25, %26 : vector<2x1xf32>
    %cst_24 = arith.constant dense<0.000000e+00> : vector<2x4xf32>
    %28 = tpu.matmul %27, %21, %cst_24 {dimension_numbers = #tpu.dot_dimension_numbers<[1], [0], [0], [1], [0, 0, 1, 1], [], []>} : vector<2x1xf32>, vector<1x4xf32>, vector<2x4xf32> -> vector<2x4xf32>
    %29 = vector.broadcast %22 : vector<1x4xf32> to vector<2x4xf32>
    %30 = arith.addf %28, %29 : vector<2x4xf32>
    %31 = arith.negf %30 : vector<2x4xf32>
    %32 = math.exp %31 : vector<2x4xf32>
    %cst_25 = arith.constant 1.000000e+00 : f32
    %33 = vector.broadcast %cst_25 : f32 to vector<2x4xf32>
    %34 = arith.addf %33, %32 : vector<2x4xf32>
    %35 = arith.divf %33, %34 : vector<2x4xf32>
    %36 = arith.addf %17, %35 : vector<2x4xf32>
    %c0_26 = arith.constant 0 : index
    %c0_27 = arith.constant 0 : index
    %37 = vector.load %arg10[%c0_26, %c0_27] : memref<2x4xf32, #tpu.memory_space<vmem>>, vector<2x4xf32>
    tpu.vector_store %arg10[%c0_26, %c0_27], %36 {strides = array<i32>} : memref<2x4xf32, #tpu.memory_space<vmem>>, vector<2x4xf32>,
    return
  }
}

module attributes {stable_mosaic.version = 11 : i64} {
  func.func @_se_mlp_kernel(%arg0: memref<2x16xf32, #tpu.memory_space<vmem>>, %arg1: memref<2x16xf32, #tpu.memory_space<vmem>>, %arg2: memref<16x1xf32, #tpu.memory_space<vmem>>, %arg3: memref<1x1xf32, #tpu.memory_space<vmem>>, %arg4: memref<1x16xf32, #tpu.memory_space<vmem>>, %arg5: memref<1x16xf32, #tpu.memory_space<vmem>>, %arg6: memref<16x1xf32, #tpu.memory_space<vmem>>, %arg7: memref<1x1xf32, #tpu.memory_space<vmem>>, %arg8: memref<1x16xf32, #tpu.memory_space<vmem>>, %arg9: memref<1x16xf32, #tpu.memory_space<vmem>>, %arg10: memref<2x16xf32, #tpu.memory_space<vmem>>) attributes {dimension_semantics = [], scalar_prefetch = 0 : i64, scratch_operands = 0 : i64, tpu.core_type = #tpu.core_type<tc>} {
    %c0 = arith.constant 0 : index
    %c0_0 = arith.constant 0 : index
    %0 = vector.load %arg0[%c0, %c0_0] : memref<2x16xf32, #tpu.memory_space<vmem>>, vector<2x16xf32>
    %c0_1 = arith.constant 0 : index
    %c0_2 = arith.constant 0 : index
    %1 = vector.load %arg2[%c0_1, %c0_2] : memref<16x1xf32, #tpu.memory_space<vmem>>, vector<16x1xf32>
    %c0_3 = arith.constant 0 : index
    %c0_4 = arith.constant 0 : index
    %2 = vector.load %arg3[%c0_3, %c0_4] : memref<1x1xf32, #tpu.memory_space<vmem>>, vector<1x1xf32>
    %c0_5 = arith.constant 0 : index
    %c0_6 = arith.constant 0 : index
    %3 = vector.load %arg4[%c0_5, %c0_6] : memref<1x16xf32, #tpu.memory_space<vmem>>, vector<1x16xf32>
    %c0_7 = arith.constant 0 : index
    %c0_8 = arith.constant 0 : index
    %4 = vector.load %arg5[%c0_7, %c0_8] : memref<1x16xf32, #tpu.memory_space<vmem>>, vector<1x16xf32>
    %cst = arith.constant dense<0.000000e+00> : vector<2x1xf32>
    %5 = tpu.matmul %0, %1, %cst {dimension_numbers = #tpu.dot_dimension_numbers<[1], [0], [0], [1], [0, 0, 1, 1], [], []>} : vector<2x16xf32>, vector<16x1xf32>, vector<2x1xf32> -> vector<2x1xf32>
    %6 = vector.broadcast %2 : vector<1x1xf32> to vector<2x1xf32>
    %7 = arith.addf %5, %6 : vector<2x1xf32>
    %cst_9 = arith.constant 0.000000e+00 : f32
    %8 = vector.broadcast %cst_9 : f32 to vector<2x1xf32>
    %9 = arith.maximumf %7, %8 : vector<2x1xf32>
    %cst_10 = arith.constant dense<0.000000e+00> : vector<2x16xf32>
    %10 = tpu.matmul %9, %3, %cst_10 {dimension_numbers = #tpu.dot_dimension_numbers<[1], [0], [0], [1], [0, 0, 1, 1], [], []>} : vector<2x1xf32>, vector<1x16xf32>, vector<2x16xf32> -> vector<2x16xf32>
    %11 = vector.broadcast %4 : vector<1x16xf32> to vector<2x16xf32>
    %12 = arith.addf %10, %11 : vector<2x16xf32>
    %13 = arith.negf %12 : vector<2x16xf32>
    %14 = math.exp %13 : vector<2x16xf32>
    %cst_11 = arith.constant 1.000000e+00 : f32
    %15 = vector.broadcast %cst_11 : f32 to vector<2x16xf32>
    %16 = arith.addf %15, %14 : vector<2x16xf32>
    %17 = arith.divf %15, %16 : vector<2x16xf32>
    %c0_12 = arith.constant 0 : index
    %c0_13 = arith.constant 0 : index
    %18 = vector.load %arg1[%c0_12, %c0_13] : memref<2x16xf32, #tpu.memory_space<vmem>>, vector<2x16xf32>
    %c0_14 = arith.constant 0 : index
    %c0_15 = arith.constant 0 : index
    %19 = vector.load %arg6[%c0_14, %c0_15] : memref<16x1xf32, #tpu.memory_space<vmem>>, vector<16x1xf32>
    %c0_16 = arith.constant 0 : index
    %c0_17 = arith.constant 0 : index
    %20 = vector.load %arg7[%c0_16, %c0_17] : memref<1x1xf32, #tpu.memory_space<vmem>>, vector<1x1xf32>
    %c0_18 = arith.constant 0 : index
    %c0_19 = arith.constant 0 : index
    %21 = vector.load %arg8[%c0_18, %c0_19] : memref<1x16xf32, #tpu.memory_space<vmem>>, vector<1x16xf32>
    %c0_20 = arith.constant 0 : index
    %c0_21 = arith.constant 0 : index
    %22 = vector.load %arg9[%c0_20, %c0_21] : memref<1x16xf32, #tpu.memory_space<vmem>>, vector<1x16xf32>
    %cst_22 = arith.constant dense<0.000000e+00> : vector<2x1xf32>
    %23 = tpu.matmul %18, %19, %cst_22 {dimension_numbers = #tpu.dot_dimension_numbers<[1], [0], [0], [1], [0, 0, 1, 1], [], []>} : vector<2x16xf32>, vector<16x1xf32>, vector<2x1xf32> -> vector<2x1xf32>
    %24 = vector.broadcast %20 : vector<1x1xf32> to vector<2x1xf32>
    %25 = arith.addf %23, %24 : vector<2x1xf32>
    %cst_23 = arith.constant 0.000000e+00 : f32
    %26 = vector.broadcast %cst_23 : f32 to vector<2x1xf32>
    %27 = arith.maximumf %25, %26 : vector<2x1xf32>
    %cst_24 = arith.constant dense<0.000000e+00> : vector<2x16xf32>
    %28 = tpu.matmul %27, %21, %cst_24 {dimension_numbers = #tpu.dot_dimension_numbers<[1], [0], [0], [1], [0, 0, 1, 1], [], []>} : vector<2x1xf32>, vector<1x16xf32>, vector<2x16xf32> -> vector<2x16xf32>
    %29 = vector.broadcast %22 : vector<1x16xf32> to vector<2x16xf32>
    %30 = arith.addf %28, %29 : vector<2x16xf32>
    %31 = arith.negf %30 : vector<2x16xf32>
    %32 = math.exp %31 : vector<2x16xf32>
    %cst_25 = arith.constant 1.000000e+00 : f32
    %33 = vector.broadcast %cst_25 : f32 to vector<2x16xf32>
    %34 = arith.addf %33, %32 : vector<2x16xf32>
    %35 = arith.divf %33, %34 : vector<2x16xf32>
    %36 = arith.addf %17, %35 : vector<2x16xf32>
    %c0_26 = arith.constant 0 : index
    %c0_27 = arith.constant 0 : index
    %37 = vector.load %arg10[%c0_26, %c0_27] : memref<2x16xf32, #tpu.memory_space<vmem>>, vector<2x16xf32>
    tpu.vector_store %arg10[%c0_26, %c0_27], %36 {strides = array<i32>} : memref<2x16xf32, #tpu.memory_space<vmem>>, vector<2x16xf32>,
    return
  }
}

module attributes {stable_mosaic.version = 11 : i64} {
  func.func @_iwt_gate_kernel(%arg0: i32, %arg1: i32, %arg2: memref<1x2x2x8x128xf32, #tpu.memory_space<vmem>>, %arg3: memref<1x5x128xf32, #tpu.memory_space<vmem>>, %arg4: memref<1x2x2x8x128xf32, #tpu.memory_space<vmem>>) attributes {dimension_semantics = [#tpu.dimension_semantics<parallel>, #tpu.dimension_semantics<parallel>], iteration_bounds = array<i64: 2, 1>, scalar_prefetch = 0 : i64, scratch_operands = 0 : i64, tpu.core_type = #tpu.core_type<tc>, window_params = [{transform_indices = @transform_0, window_bounds = array<i64: 1, 2, 2, 8, 128>}, {transform_indices = @transform_1, window_bounds = array<i64: 1, 5, 128>}, {transform_indices = @transform_2, window_bounds = array<i64: 1, 2, 2, 8, 128>}]} {
    %c0 = arith.constant 0 : index
    %c0_0 = arith.constant 0 : index
    %c0_1 = arith.constant 0 : index
    %0 = vector.load %arg3[%c0, %c0_0, %c0_1] : memref<1x5x128xf32, #tpu.memory_space<vmem>>, vector<1x1x128xf32>
    %1 = vector.shape_cast %0 : vector<1x1x128xf32> to vector<1x128xf32>
    %c0_2 = arith.constant 0 : index
    %c1 = arith.constant 1 : index
    %c0_3 = arith.constant 0 : index
    %2 = vector.load %arg3[%c0_2, %c1, %c0_3] : memref<1x5x128xf32, #tpu.memory_space<vmem>>, vector<1x1x128xf32>
    %3 = vector.shape_cast %2 : vector<1x1x128xf32> to vector<1x128xf32>
    %c0_4 = arith.constant 0 : index
    %c2 = arith.constant 2 : index
    %c0_5 = arith.constant 0 : index
    %4 = vector.load %arg3[%c0_4, %c2, %c0_5] : memref<1x5x128xf32, #tpu.memory_space<vmem>>, vector<1x1x128xf32>
    %5 = vector.shape_cast %4 : vector<1x1x128xf32> to vector<1x128xf32>
    %c0_6 = arith.constant 0 : index
    %c3 = arith.constant 3 : index
    %c0_7 = arith.constant 0 : index
    %6 = vector.load %arg3[%c0_6, %c3, %c0_7] : memref<1x5x128xf32, #tpu.memory_space<vmem>>, vector<1x1x128xf32>
    %7 = vector.shape_cast %6 : vector<1x1x128xf32> to vector<1x128xf32>
    %c0_8 = arith.constant 0 : index
    %c4 = arith.constant 4 : index
    %c0_9 = arith.constant 0 : index
    %8 = vector.load %arg3[%c0_8, %c4, %c0_9] : memref<1x5x128xf32, #tpu.memory_space<vmem>>, vector<1x1x128xf32>
    %9 = vector.shape_cast %8 : vector<1x1x128xf32> to vector<1x128xf32>
    %c0_10 = arith.constant 0 : index
    %c0_11 = arith.constant 0 : index
    %c0_12 = arith.constant 0 : index
    %c0_13 = arith.constant 0 : index
    %c0_14 = arith.constant 0 : index
    %10 = vector.load %arg2[%c0_10, %c0_11, %c0_12, %c0_13, %c0_14] : memref<1x2x2x8x128xf32, #tpu.memory_space<vmem>>, vector<1x1x1x8x128xf32>
    %11 = vector.shape_cast %10 : vector<1x1x1x8x128xf32> to vector<8x128xf32>
    %12 = vector.broadcast %1 : vector<1x128xf32> to vector<8x128xf32>
    %13 = arith.mulf %11, %12 : vector<8x128xf32>
    %c0_15 = arith.constant 0 : index
    %c1_16 = arith.constant 1 : index
    %c0_17 = arith.constant 0 : index
    %c0_18 = arith.constant 0 : index
    %c0_19 = arith.constant 0 : index
    %14 = vector.load %arg2[%c0_15, %c1_16, %c0_17, %c0_18, %c0_19] : memref<1x2x2x8x128xf32, #tpu.memory_space<vmem>>, vector<1x1x1x8x128xf32>
    %15 = vector.shape_cast %14 : vector<1x1x1x8x128xf32> to vector<8x128xf32>
    %16 = vector.broadcast %1 : vector<1x128xf32> to vector<8x128xf32>
    %17 = arith.mulf %15, %16 : vector<8x128xf32>
    %c0_20 = arith.constant 0 : index
    %c0_21 = arith.constant 0 : index
    %c1_22 = arith.constant 1 : index
    %c0_23 = arith.constant 0 : index
    %c0_24 = arith.constant 0 : index
    %18 = vector.load %arg2[%c0_20, %c0_21, %c1_22, %c0_23, %c0_24] : memref<1x2x2x8x128xf32, #tpu.memory_space<vmem>>, vector<1x1x1x8x128xf32>
    %19 = vector.shape_cast %18 : vector<1x1x1x8x128xf32> to vector<8x128xf32>
    %20 = vector.broadcast %1 : vector<1x128xf32> to vector<8x128xf32>
    %21 = arith.mulf %19, %20 : vector<8x128xf32>
    %c0_25 = arith.constant 0 : index
    %c1_26 = arith.constant 1 : index
    %c1_27 = arith.constant 1 : index
    %c0_28 = arith.constant 0 : index
    %c0_29 = arith.constant 0 : index
    %22 = vector.load %arg2[%c0_25, %c1_26, %c1_27, %c0_28, %c0_29] : memref<1x2x2x8x128xf32, #tpu.memory_space<vmem>>, vector<1x1x1x8x128xf32>
    %23 = vector.shape_cast %22 : vector<1x1x1x8x128xf32> to vector<8x128xf32>
    %24 = vector.broadcast %1 : vector<1x128xf32> to vector<8x128xf32>
    %25 = arith.mulf %23, %24 : vector<8x128xf32>
    %26 = arith.addf %13, %17 : vector<8x128xf32>
    %27 = arith.addf %21, %25 : vector<8x128xf32>
    %28 = arith.subf %17, %13 : vector<8x128xf32>
    %29 = arith.subf %25, %21 : vector<8x128xf32>
    %30 = arith.addf %26, %27 : vector<8x128xf32>
    %31 = arith.subf %27, %26 : vector<8x128xf32>
    %32 = arith.addf %28, %29 : vector<8x128xf32>
    %33 = arith.subf %29, %28 : vector<8x128xf32>
    %34 = vector.broadcast %3 : vector<1x128xf32> to vector<8x128xf32>
    %35 = arith.mulf %30, %34 : vector<8x128xf32>
    %36 = vector.broadcast %5 : vector<1x128xf32> to vector<8x128xf32>
    %37 = arith.mulf %31, %36 : vector<8x128xf32>
    %38 = vector.broadcast %7 : vector<1x128xf32> to vector<8x128xf32>
    %39 = arith.mulf %32, %38 : vector<8x128xf32>
    %40 = vector.broadcast %9 : vector<1x128xf32> to vector<8x128xf32>
    %41 = arith.mulf %33, %40 : vector<8x128xf32>
    %42 = arith.subf %35, %37 : vector<8x128xf32>
    %43 = arith.subf %42, %39 : vector<8x128xf32>
    %44 = arith.addf %43, %41 : vector<8x128xf32>
    %45 = math.tanh %44 : vector<8x128xf32>
    %cst = arith.constant 1.000000e+00 : f32
    %46 = vector.broadcast %cst : f32 to vector<8x128xf32>
    %47 = arith.addf %45, %46 : vector<8x128xf32>
    %cst_30 = arith.constant 5.000000e-01 : f32
    %48 = vector.broadcast %cst_30 : f32 to vector<8x128xf32>
    %49 = arith.mulf %48, %47 : vector<8x128xf32>
    %50 = arith.mulf %13, %49 : vector<8x128xf32>
    %c0_31 = arith.constant 0 : index
    %c0_32 = arith.constant 0 : index
    %c0_33 = arith.constant 0 : index
    %c0_34 = arith.constant 0 : index
    %c0_35 = arith.constant 0 : index
    %51 = vector.load %arg4[%c0_31, %c0_32, %c0_33, %c0_34, %c0_35] : memref<1x2x2x8x128xf32, #tpu.memory_space<vmem>>, vector<1x1x1x8x128xf32>
    %52 = vector.shape_cast %51 : vector<1x1x1x8x128xf32> to vector<8x128xf32>
    %53 = vector.shape_cast %50 : vector<8x128xf32> to vector<1x1x1x8x128xf32>
    tpu.vector_store %arg4[%c0_31, %c0_32, %c0_33, %c0_34, %c0_35], %53 {strides = array<i32>} : memref<1x2x2x8x128xf32, #tpu.memory_space<vmem>>, vector<1x1x1x8x128xf32>,
    %54 = arith.subf %35, %37 : vector<8x128xf32>
    %55 = arith.addf %54, %39 : vector<8x128xf32>
    %56 = arith.subf %55, %41 : vector<8x128xf32>
    %57 = math.tanh %56 : vector<8x128xf32>
    %cst_36 = arith.constant 1.000000e+00 : f32
    %58 = vector.broadcast %cst_36 : f32 to vector<8x128xf32>
    %59 = arith.addf %57, %58 : vector<8x128xf32>
    %cst_37 = arith.constant 5.000000e-01 : f32
    %60 = vector.broadcast %cst_37 : f32 to vector<8x128xf32>
    %61 = arith.mulf %60, %59 : vector<8x128xf32>
    %62 = arith.mulf %17, %61 : vector<8x128xf32>
    %c0_38 = arith.constant 0 : index
    %c1_39 = arith.constant 1 : index
    %c0_40 = arith.constant 0 : index
    %c0_41 = arith.constant 0 : index
    %c0_42 = arith.constant 0 : index
    %63 = vector.load %arg4[%c0_38, %c1_39, %c0_40, %c0_41, %c0_42] : memref<1x2x2x8x128xf32, #tpu.memory_space<vmem>>, vector<1x1x1x8x128xf32>
    %64 = vector.shape_cast %63 : vector<1x1x1x8x128xf32> to vector<8x128xf32>
    %65 = vector.shape_cast %62 : vector<8x128xf32> to vector<1x1x1x8x128xf32>
    tpu.vector_store %arg4[%c0_38, %c1_39, %c0_40, %c0_41, %c0_42], %65 {strides = array<i32>} : memref<1x2x2x8x128xf32, #tpu.memory_space<vmem>>, vector<1x1x1x8x128xf32>,
    %66 = arith.addf %35, %37 : vector<8x128xf32>
    %67 = arith.subf %66, %39 : vector<8x128xf32>
    %68 = arith.subf %67, %41 : vector<8x128xf32>
    %69 = math.tanh %68 : vector<8x128xf32>
    %cst_43 = arith.constant 1.000000e+00 : f32
    %70 = vector.broadcast %cst_43 : f32 to vector<8x128xf32>
    %71 = arith.addf %69, %70 : vector<8x128xf32>
    %cst_44 = arith.constant 5.000000e-01 : f32
    %72 = vector.broadcast %cst_44 : f32 to vector<8x128xf32>
    %73 = arith.mulf %72, %71 : vector<8x128xf32>
    %74 = arith.mulf %21, %73 : vector<8x128xf32>
    %c0_45 = arith.constant 0 : index
    %c0_46 = arith.constant 0 : index
    %c1_47 = arith.constant 1 : index
    %c0_48 = arith.constant 0 : index
    %c0_49 = arith.constant 0 : index
    %75 = vector.load %arg4[%c0_45, %c0_46, %c1_47, %c0_48, %c0_49] : memref<1x2x2x8x128xf32, #tpu.memory_space<vmem>>, vector<1x1x1x8x128xf32>
    %76 = vector.shape_cast %75 : vector<1x1x1x8x128xf32> to vector<8x128xf32>
    %77 = vector.shape_cast %74 : vector<8x128xf32> to vector<1x1x1x8x128xf32>
    tpu.vector_store %arg4[%c0_45, %c0_46, %c1_47, %c0_48, %c0_49], %77 {strides = array<i32>} : memref<1x2x2x8x128xf32, #tpu.memory_space<vmem>>, vector<1x1x1x8x128xf32>,
    %78 = arith.addf %35, %37 : vector<8x128xf32>
    %79 = arith.addf %78, %39 : vector<8x128xf32>
    %80 = arith.addf %79, %41 : vector<8x128xf32>
    %81 = math.tanh %80 : vector<8x128xf32>
    %cst_50 = arith.constant 1.000000e+00 : f32
    %82 = vector.broadcast %cst_50 : f32 to vector<8x128xf32>
    %83 = arith.addf %81, %82 : vector<8x128xf32>
    %cst_51 = arith.constant 5.000000e-01 : f32
    %84 = vector.broadcast %cst_51 : f32 to vector<8x128xf32>
    %85 = arith.mulf %84, %83 : vector<8x128xf32>
    %86 = arith.mulf %25, %85 : vector<8x128xf32>
    %c0_52 = arith.constant 0 : index
    %c1_53 = arith.constant 1 : index
    %c1_54 = arith.constant 1 : index
    %c0_55 = arith.constant 0 : index
    %c0_56 = arith.constant 0 : index
    %87 = vector.load %arg4[%c0_52, %c1_53, %c1_54, %c0_55, %c0_56] : memref<1x2x2x8x128xf32, #tpu.memory_space<vmem>>, vector<1x1x1x8x128xf32>
    %88 = vector.shape_cast %87 : vector<1x1x1x8x128xf32> to vector<8x128xf32>
    %89 = vector.shape_cast %86 : vector<8x128xf32> to vector<1x1x1x8x128xf32>
    tpu.vector_store %arg4[%c0_52, %c1_53, %c1_54, %c0_55, %c0_56], %89 {strides = array<i32>} : memref<1x2x2x8x128xf32, #tpu.memory_space<vmem>>, vector<1x1x1x8x128xf32>,
    return
  }
  func.func @transform_0(%arg0: i32, %arg1: i32) -> (i32, i32, i32, i32, i32) {
    %c0_i32 = arith.constant 0 : i32
    %c0_i32_0 = arith.constant 0 : i32
    %c0_i32_1 = arith.constant 0 : i32
    %c0_i32_2 = arith.constant 0 : i32
    return %arg0, %c0_i32, %c0_i32_0, %arg1, %c0_i32_1 : i32, i32, i32, i32, i32
  }
  func.func @transform_1(%arg0: i32, %arg1: i32) -> (i32, i32, i32) {
    %c0_i32 = arith.constant 0 : i32
    %c0_i32_0 = arith.constant 0 : i32
    %c0_i32_1 = arith.constant 0 : i32
    return %arg0, %c0_i32, %c0_i32_0 : i32, i32, i32
  }
  func.func @transform_2(%arg0: i32, %arg1: i32) -> (i32, i32, i32, i32, i32) {
    %c0_i32 = arith.constant 0 : i32
    %c0_i32_0 = arith.constant 0 : i32
    %c0_i32_1 = arith.constant 0 : i32
    %c0_i32_2 = arith.constant 0 : i32
    return %arg0, %c0_i32, %c0_i32_0, %arg1, %c0_i32_1 : i32, i32, i32, i32, i32
  }
}

</mosaic_0001>

<bundles_post_ra>
// kernel: wgb_forward.4
= control target key start
LH: loop header
LB: loop body
LE: loop exit
PB: predicated region body
PF: predicated region fallthrough
CT: control target
= control target key end

     0   :  { %s423_s6 = smov 0   ;;  %s425_s7 = smov 0   ;;  %s466_s0 = inlined_call_operand.vmem [shape: f32[2,2,2,8,128], index: 0, kind: input, shape index: {}]   ;;  %s467_s1 = inlined_call_operand.vmem [shape: f32[2,1,2,4,128], index: 1, kind: output, shape index: {}]  }
   0x1   :  { %s427_s8 = smov 0  }
   0x2 LB: > { %s30_s9 = sadd.s32 1, %s407_s7  ;;  %p350_p0 = scmp.ge.s32.totalorder %s411_s8, 1  ;;  %s411_s8 = sphi %s427_s8, %s11_s8   ;;  %s407_s7 = sphi %s425_s7, %s469_s7   ;;  %s403_s6 = sphi %s423_s6, %s468_s6  }
   0x3   : > { %p32_p1 = scmp.ge.s32.totalorder %s30_s9, 2  ;;  %p117_p2 = scmp.lt.s32.totalorder %s411_s8, 3 }
   0x5   : > { %s471_s9 = smov (%p32_p1, %s30_s9), 0  ;;  %p118_p3 = pnand %p350_p0, %p117_p2 }
   0x6   : > { %p146_p4 = scmp.lt.s32.totalorder (!%p118_p3), %s403_s6, 1 }
   0x7   : > { %121 = sbr.rel (%p118_p3) target bundleno = 38 (0x26), region = 24 }
   0xc   : > { %s473_s6 = smov (!%p146_p4, %s403_s6), 1  ;;  %vm203_vm0 = vcmask 1040384   ;;  %vm205_vm1 = vcmask 1041408   ;;  %vm207_vm2 = vcmask 1042432  }
   0xd   : > { %s363_s10 = sshll.u32 %s473_s6, 5  ;;  %s364_s14 = sshll.u32 %s473_s6, 3 }
   0xe   : > { %s153_s13 = scalar_lea.vmem %s466_s0, %s363_s10  ;;  %s163_s17 = scalar_lea.vmem %s467_s1, %s364_s14 }
   0xf   : > { %v164_v0 = vld [vmem:[%s153_s13] sm:$0xff]  ;;  %v355_v1 = vld [vmem:[%s153_s13 + $0x10] sm:$0xff]  ;;  %v356_v2 = vld [vmem:[%s153_s13 + $0x8] sm:$0xff] }
  0x10   : > { %v357_v3 = vld [vmem:[%s153_s13 + $0x18] sm:$0xff]  ;;  %v171_v4 = vadd.f32 %v355_v1, %v164_v0  ;;  %v173_v5 = vsub.f32 %v355_v1, %v164_v0 }
  0x11   : > { %v172_v6 = vadd.f32 %v357_v3, %v356_v2  ;;  %v174_v7 = vsub.f32 %v357_v3, %v356_v2 }
  0x13   : > { %v175_v8 = vadd.f32 %v172_v6, %v171_v4  ;;  %v176_v9 = vsub.f32 %v172_v6, %v171_v4  ;;  %v177_v10 = vadd.f32 %v174_v7, %v173_v5  ;;  %v178_v11 = vsub.f32 %v174_v7, %v173_v5 }
  0x15   : > { %v179_v12 = vrot.slane %v175_v8, 4  ;;  %v185_v13 = vrot.slane %v176_v9, 4  ;;  %v191_v14 = vrot.slane %v177_v10, 4  ;;  %v197_v15 = vrot.slane %v178_v11, 4 }
  0x17   : > { %v180_v16 = vadd.f32 %v179_v12, %v175_v8  ;;  %v186_v17 = vadd.f32 %v185_v13, %v176_v9  ;;  %v192_v18 = vadd.f32 %v191_v14, %v177_v10  ;;  %v198_v19 = vadd.f32 %v197_v15, %v178_v11 }
  0x18   : > { %v210_v20 = vmax.f32 %v175_v8, %v179_v12  ;;  %v216_v21 = vmax.f32 %v176_v9, %v185_v13  ;;  %v222_v22 = vmax.f32 %v177_v10, %v191_v14  ;;  %v228_v23 = vmax.f32 %v178_v11, %v197_v15 }
  0x19   : > { %v181_v24 = vrot.slane %v180_v16, 2  ;;  %v187_v25 = vrot.slane %v186_v17, 2  ;;  %v193_v26 = vrot.slane %v192_v18, 2  ;;  %v199_v27 = vrot.slane %v198_v19, 2 }
  0x1a   : > { %v211_v28 = vrot.slane %v210_v20, 2  ;;  %v217_v29 = vrot.slane %v216_v21, 2  ;;  %v223_v30 = vrot.slane %v222_v22, 2  ;;  %v229_v31 = vrot.slane %v228_v23, 2 }
  0x1b   : > { %v182_v32 = vadd.f32 %v181_v24, %v180_v16  ;;  %v188_v33 = vadd.f32 %v187_v25, %v186_v17  ;;  %v194_v34 = vadd.f32 %v193_v26, %v192_v18  ;;  %v200_v35 = vadd.f32 %v199_v27, %v198_v19 }
  0x1c   : > { %v212_v36 = vmax.f32 %v210_v20, %v211_v28  ;;  %v218_v37 = vmax.f32 %v216_v21, %v217_v29  ;;  %v224_v38 = vmax.f32 %v222_v22, %v223_v30  ;;  %v230_v39 = vmax.f32 %v228_v23, %v229_v31 }
  0x1d   : > { %v183_v40 = vrot.slane %v182_v32, 1  ;;  %v189_v41 = vrot.slane %v188_v33, 1  ;;  %v195_v42 = vrot.slane %v194_v34, 1  ;;  %v201_v43 = vrot.slane %v200_v35, 1 }
  0x1e   : > { %v213_v44 = vrot.slane %v212_v36, 1  ;;  %v219_v45 = vrot.slane %v218_v37, 1  ;;  %v225_v46 = vrot.slane %v224_v38, 1  ;;  %v231_v47 = vrot.slane %v230_v39, 1 }
  0x1f   : > { %v184_v48 = vadd.f32 %v183_v40, %v182_v32  ;;  %v190_v49 = vadd.f32 %v189_v41, %v188_v33  ;;  %v196_v50 = vadd.f32 %v195_v42, %v194_v34  ;;  %v202_v51 = vadd.f32 %v201_v43, %v200_v35 }
  0x20   : > { %v214_v52 = vmax.f32 %v212_v36, %v213_v44  ;;  %v220_v53 = vmax.f32 %v218_v37, %v219_v45  ;;  %v226_v54 = vmax.f32 %v224_v38, %v225_v46  ;;  %v232_v55 = vmax.f32 %v230_v39, %v231_v47 }
  0x21   : > { %v204_v56 = vsel %vm203_vm0, %v184_v48, %v190_v49 }
  0x22   : > { %v206_v57 = vsel %vm205_vm1, %v204_v56, %v196_v50  ;;  %v233_v58 = vsel %vm203_vm0, %v214_v52, %v220_v53 }
  0x23   : > { %v208_v59 = vsel %vm207_vm2, %v206_v57, %v202_v51  ;;  %v234_v60 = vsel %vm205_vm1, %v233_v58, %v226_v54 }
  0x24   : > { %240 = vst [vmem:[%s163_s17] sm:$0xf] %v208_v59  ;;  %v235_v61 = vsel %vm207_vm2, %v234_v60, %v232_v55 }
  0x25   : > { %358 = vst [vmem:[%s163_s17 + $0x4] sm:$0xf] %v235_v61 }
  0x26 PF: > { %s11_s8 = sadd.s32 1, %s411_s8   ;;  %s468_s6 = smov %s407_s7 }
  0x27   : > { %p8_p5 = scmp.ge.s32.totalorder %s11_s8, 4   ;;  %s469_s7 = smov %s471_s9 }
  0x29   :  { %10 = sbr.rel (!%p8_p5) target bundleno = 2 (0x2), region = 67 }

// kernel: wgb_forward.5
= control target key start
LH: loop header
LB: loop body
LE: loop exit
PB: predicated region body
PF: predicated region fallthrough
CT: control target
= control target key end

     0   :  { %vm48_vm0 = vcmask 130048   ;;  %vm80_vm1 = vcmask 1040384   ;;  %vm76_vm2 = vcmask 7168   ;;  %vm205_vm11 = vcmask 25600   ;;  %s325_s2 = inlined_call_operand.vmem [shape: f32[16,1], index: 2, kind: input, shape index: {}]   ;;  %s326_s6 = inlined_call_operand.vmem [shape: f32[16,1], index: 6, kind: input, shape index: {}]   ;;  %s327_s0 = inlined_call_operand.vmem [shape: f32[2,16], index: 0, kind: input, shape index: {}]   ;;  %s328_s1 = inlined_call_operand.vmem [shape: f32[2,16], index: 1, kind: input, shape index: {}]   ;;  %s329_s3 = inlined_call_operand.<no memory space> [shape: f32[1,1], index: 3, kind: input, shape index: {}]   ;;  %s330_s5 = inlined_call_operand.vmem [shape: f32[1,4], index: 5, kind: input, shape index: {}]   ;;  %s331_s7 = inlined_call_operand.<no memory space> [shape: f32[1,1], index: 7, kind: input, shape index: {}]   ;;  %s332_s4 = inlined_call_operand.vmem [shape: f32[1,4], index: 4, kind: input, shape index: {}]   ;;  %s333_s8 = inlined_call_operand.vmem [shape: f32[1,4], index: 8, kind: input, shape index: {}]   ;;  %s334_s9 = inlined_call_operand.vmem [shape: f32[1,4], index: 9, kind: input, shape index: {}]   ;;  %s335_s10 = inlined_call_operand.vmem [shape: f32[2,4], index: 10, kind: output, shape index: {}]  }
   0x1   :  { %v41_v0 = vld [vmem:[%s325_s2 + $0x8] sm:$0xff]  ;;  %v40_v2 = vld [vmem:[%s325_s2] sm:$0xff]  ;;  %v15_v3 = vstv %s329_s3  ;;  %v17_v7 = vstv %s331_s7 }
   0x2   :  { %v125_v1 = vld [vmem:[%s326_s6 + $0x8] sm:$0xff]  ;;  %66 = vmatpush.msra.mxu0 %v41_v0  ;;  %v124_v4 = vld [vmem:[%s326_s6] sm:$0xff]  ;;  %16 = vst [vmem:[#allocation2] sm:$0x1] %v15_v3 }
   0x3   :  { %149 = vmatpush.msra.mxu2 %v125_v1  ;;  %v39_v5 = vld [vmem:[%s327_s0] sm:$0x3]  ;;  %18 = vst [vmem:[#allocation3] sm:$0x1] %v17_v7 }
   0x4   :  { %v123_v6 = vld [vmem:[%s328_s1] sm:$0x3]  ;;  %67 = vmatpush.msra.mxu0 %v40_v2 }
   0x5   :  { %150 = vmatpush.msra.mxu2 %v124_v4  ;;  %211 = vmatmul.msk.f32.vlgmr.msra.gmra.mxu0 %vm48_vm0, %v39_v5  ;;  %v43_v8 = vld [vmem:[%s332_s4] sm:$0x1] }
   0x6   :  { %215 = vmatmul.msk.f32.vlgmr.msra.gmra.mxu2 %vm48_vm0, %v123_v6  ;;  %212 = vmatpush.msk.msra.mxu1 %vm80_vm1, %v43_v8  ;;  %v127_v9 = vld [vmem:[%s333_s8] sm:$0x1] }
   0x7   :  { %216 = vmatpush.msk.msra.mxu3 %vm80_vm1, %v127_v9  ;;  %v221_v18 = vld [vmem:[%s330_s5] ss:$0 sm:$0xff] }
   0x8   :  { %v222_v22 = vld [vmem:[%s334_s9] ss:$0 sm:$0xff] }
   0x9   :  { %v219_v10 = vld [vmem:[#allocation2] ss:$0 sm:$0xff] }
   0xa   :  { %v220_v14 = vld [vmem:[#allocation3] ss:$0 sm:$0xff] }
  0x82   :  { %v69_v11 = vpop.f32.mrf.mxu0 }
  0x83   :  { %v70_v12 = vadd.f32 %v219_v10, %v69_v11 }
  0x85   :  { %v72_v13 = vmax.f32 %v70_v12, 0.0 }
  0x87   :  { %213 = vmatmul.msk.f32.vlgmr.msra.gmra.mxu1 %vm76_vm2, %v72_v13 }
  0x89   :  { %v152_v15 = vpop.f32.mrf.mxu2 }
  0x8a   :  { %v153_v16 = vadd.f32 %v220_v14, %v152_v15 }
  0x8c   :  { %v155_v17 = vmax.f32 %v153_v16, 0.0 }
  0x8e   :  { %217 = vmatmul.msk.f32.vlgmr.msra.gmra.mxu3 %vm76_vm2, %v155_v17 }
 0x104   :  { %v101_v19 = vpop.f32.mrf.mxu1 }
 0x105   :  { %v102_v20 = vadd.f32 %v221_v18, %v101_v19 }
 0x107   :  { %v214_v21 = vmul.f32 -1.442695, %v102_v20 }
 0x109   :  { %223 = vpow2.f32 %v214_v21 }
 0x10f   :  { %v224_v23 = vpop.eup %223 }
 0x110   :  { %v107_v24 = vadd.f32 1.0, %v224_v23 }
 0x111   :  { %v182_v25 = vpop.f32.mrf.mxu3 }
 0x112   :  { %v183_v26 = vadd.f32 %v222_v22, %v182_v25  ;;  %225 = vrcp.f32 %v107_v24  ;;  %vm113_vm3 = vweird.f32 %v107_v24  ;;  %v119_v36 = vand.u32 2147483648, %v107_v24 }
 0x113   :  { %v117_v38 = vand.u32 2147483647, %v107_v24 }
 0x114   :  { %v218_v27 = vmul.f32 -1.442695, %v183_v26  ;;  %v120_v43 = vor.u32 1.1754944e-38, %v119_v36 }
 0x115   :  { %vm118_vm7 = vcmp.eq.f32.partialorder %v117_v38, 8.507059e+37 }
 0x116   :  { %227 = vpow2.f32 %v218_v27 }
 0x118   :  { %v226_v28 = vpop.eup %225 }
 0x119   :  { %v109_v30 = vmul.f32 %v226_v28, %v107_v24  ;;  %vm114_vm4 = vweird.f32 %v226_v28 }
 0x11a   :  { %vm115_vm5 = vmor %vm113_vm3, %vm114_vm4 }
 0x11b   :  { %v110_v32 = vsub.f32 1.0, %v109_v30 }
 0x11c   :  { %v228_v29 = vpop.eup %227 }
 0x11d   :  { %v188_v31 = vadd.f32 1.0, %v228_v29  ;;  %v111_v33 = vmul.f32 %v226_v28, %v110_v32 }
 0x11f   :  { %229 = vrcp.f32 %v188_v31  ;;  %v112_v37 = vadd.f32 %v226_v28, %v111_v33  ;;  %v200_v40 = vand.u32 2147483648, %v188_v31  ;;  %v198_v42 = vand.u32 2147483647, %v188_v31 }
 0x120   :  { %vm194_vm8 = vweird.f32 %v188_v31 }
 0x121   :  { %v116_v44 = vsel %vm115_vm5, %v226_v28, %v112_v37  ;;  %v201_v46 = vor.u32 1.1754944e-38, %v200_v40  ;;  %vm199_vm10 = vcmp.eq.f32.partialorder %v198_v42, 8.507059e+37 }
 0x122   :  { %v121_v48 = vsel %vm118_vm7, %v120_v43, %v116_v44 }
 0x125   :  { %v230_v34 = vpop.eup %229 }
 0x126   :  { %v190_v35 = vmul.f32 %v230_v34, %v188_v31  ;;  %vm195_vm6 = vweird.f32 %v230_v34 }
 0x127   :  { %vm196_vm9 = vmor %vm194_vm8, %vm195_vm6 }
 0x128   :  { %v191_v39 = vsub.f32 1.0, %v190_v35 }
 0x12a   :  { %v192_v41 = vmul.f32 %v230_v34, %v191_v39 }
 0x12c   :  { %v193_v45 = vadd.f32 %v230_v34, %v192_v41 }
 0x12e   :  { %v197_v47 = vsel %vm196_vm9, %v230_v34, %v193_v45 }
 0x12f   :  { %v202_v49 = vsel %vm199_vm10, %v201_v46, %v197_v47 }
 0x130   :  { %v204_v50 = vadd.f32 %v202_v49, %v121_v48 }
 0x132   :  { %206 = vst.msk [vmem:[%s335_s10] sm:$0x3] %vm205_vm11, %v204_v50 }

// kernel: tile.25
= control target key start
LH: loop header
LB: loop body
LE: loop exit
PB: predicated region body
PF: predicated region fallthrough
CT: control target
= control target key end

     0   :  { %vm4_vm0 = vcmask 1047556   ;;  %s128_s14 = smov 28   ;;  %s129_s15 = smov 20   ;;  %vm6_vm1 = vcmask 31744   ;;  %vm18_vm2 = vcmask 261344   ;;  %vm30_vm3 = vcmask 228544   ;;  %s207_s0 = inlined_call_operand.vmem [shape: f32[2,4,8,1,1,4], index: 0, kind: input, shape index: {}]   ;;  %s208_s1 = inlined_call_operand.vmem [shape: f32[2,4,32], index: 1, kind: output, shape index: {}]  }
   0x1   :  { %v106_v0 = vld [vmem:[%s207_s0 + $0x7] ss:$8 sm:$0xf]   ;;  %v110_v2 = vld [vmem:[%s207_s0 + $0x5] ss:$8 sm:$0xf]  }
   0x2   :  { %v107_v1 = vld [vmem:[%s207_s0 + $0x7] ss:$8 sm:$0xf0]   ;;  %v111_v4 = vld [vmem:[%s207_s0 + $0x5] ss:$8 sm:$0xf0]  }
   0x3   :  { %v15_v3 = vsel %vm4_vm0, %v107_v1, %v106_v0  ;;  %v39_v5 = vsel %vm4_vm0, %v111_v4, %v110_v2  ;;  %v108_v6 = vld [vmem:[%s207_s0 + $0x6] ss:$8 sm:$0xf]   ;;  %v112_v8 = vld [vmem:[%s207_s0 + $0x4] ss:$8 sm:$0xf]  }
   0x4   :  { %16 = vrot.lane.b32.xlu0 %v15_v3, %s128_s14  ;;  %40 = vrot.lane.b32.xlu1 %v39_v5, %s129_s15  ;;  %v109_v7 = vld [vmem:[%s207_s0 + $0x6] ss:$8 sm:$0xf0]   ;;  %v113_v9 = vld [vmem:[%s207_s0 + $0x4] ss:$8 sm:$0xf0]  }
   0x5   :  { %v114_v10 = vld [vmem:[%s207_s0 + $0x3] ss:$8 sm:$0xf]   ;;  %v27_v12 = vsel %vm4_vm0, %v109_v7, %v108_v6  ;;  %v51_v14 = vsel %vm4_vm0, %v113_v9, %v112_v8  ;;  %s130_s28 = smov 12   ;;  %s131_s29 = smov 24   ;;  %vm42_vm4 = vcmask 195744  }
   0x6   :  { %v115_v11 = vld [vmem:[%s207_s0 + $0x3] ss:$8 sm:$0xf0]   ;;  %v116_v15 = vld [vmem:[%s207_s0 + $0x2] ss:$8 sm:$0xf]  }
   0x7   :  { %v63_v13 = vsel %vm4_vm0, %v115_v11, %v114_v10  ;;  %v117_v16 = vld [vmem:[%s207_s0 + $0x2] ss:$8 sm:$0xf0]   ;;  %s132_s5 = smov 16   ;;  %s133_s10 = smov 8   ;;  %vm54_vm5 = vcmask 162944  }
   0x8   :  { %64 = vrot.lane.b32.xlu2 %v63_v13, %s130_s28  ;;  %v118_v17 = vld [vmem:[%s207_s0 + $0x1] ss:$8 sm:$0xf]   ;;  %v75_v19 = vsel %vm4_vm0, %v117_v16, %v116_v15  ;;  %s134_s11 = smov 4   ;;  %vm66_vm6 = vcmask 130144   ;;  %vm78_vm7 = vcmask 97344  }
   0x9   :  { %v119_v18 = vld [vmem:[%s207_s0 + $0x1] ss:$8 sm:$0xf0]   ;;  %v2_v21 = vld [vmem:[%s207_s0] ss:$8 sm:$0xf]  }
   0xa   :  { %v87_v20 = vsel %vm4_vm0, %v119_v18, %v118_v17  ;;  %v3_v22 = vld [vmem:[%s207_s0] ss:$8 sm:$0xf0]   ;;  %vm90_vm8 = vcmask 64544  }
   0xb   :  { %v5_v23 = vsel %vm4_vm0, %v3_v22, %v2_v21 }
   0xc   :  { %28 = vrot.lane.b32.xlu0 %v27_v12, %s131_s29  ;;  %52 = vrot.lane.b32.xlu1 %v51_v14, %s132_s5  ;;  %7 = vst.msk [vmem:[#allocation0] sm:$0xf] %vm6_vm1, %v5_v23  }
   0xd   :  { %9 = vst.msk [vmem:[#allocation0 + $0x4] sm:$0xf0] %vm6_vm1, %v5_v23  }
  0x10   :  { %76 = vrot.lane.b32.xlu2 %v75_v19, %s133_s10 }
  0x14   :  { %88 = vrot.lane.b32.xlu0 %v87_v20, %s134_s11 }
  0x62   :  { %v65_v24 = vpop.permute.xlu2 %64  }
  0x6a   :  { %v77_v25 = vpop.permute.xlu2 %76  }
  0x76   :  { %v17_v26 = vpop.permute.xlu0 %16   ;;  %v41_v27 = vpop.permute.xlu1 %40  }
  0x77   :  { %19 = vst.msk [vmem:[#allocation0] sm:$0xf] %vm18_vm2, %v17_v26  }
  0x78   :  { %21 = vst.msk [vmem:[#allocation0 + $0x4] sm:$0xf0] %vm18_vm2, %v17_v26  }
  0x7e   :  { %v29_v28 = vpop.permute.xlu0 %28   ;;  %v53_v29 = vpop.permute.xlu1 %52  }
  0x7f   :  { %31 = vst.msk [vmem:[#allocation0] sm:$0xf] %vm30_vm3, %v29_v28  }
  0x80   :  { %33 = vst.msk [vmem:[#allocation0 + $0x4] sm:$0xf0] %vm30_vm3, %v29_v28  }
  0x81   :  { %43 = vst.msk [vmem:[#allocation0] sm:$0xf] %vm42_vm4, %v41_v27  }
  0x82   :  { %45 = vst.msk [vmem:[#allocation0 + $0x4] sm:$0xf0] %vm42_vm4, %v41_v27  }
  0x83   :  { %55 = vst.msk [vmem:[#allocation0] sm:$0xf] %vm54_vm5, %v53_v29  }
  0x84   :  { %57 = vst.msk [vmem:[#allocation0 + $0x4] sm:$0xf0] %vm54_vm5, %v53_v29  }
  0x85   :  { %67 = vst.msk [vmem:[#allocation0] sm:$0xf] %vm66_vm6, %v65_v24  }
  0x86   :  { %69 = vst.msk [vmem:[#allocation0 + $0x4] sm:$0xf0] %vm66_vm6, %v65_v24   ;;  %v89_v30 = vpop.permute.xlu0 %88  }
  0x87   :  { %79 = vst.msk [vmem:[#allocation0] sm:$0xf] %vm78_vm7, %v77_v25  }
  0x88   :  { %81 = vst.msk [vmem:[#allocation0 + $0x4] sm:$0xf0] %vm78_vm7, %v77_v25  }
  0x89   :  { %91 = vst.msk [vmem:[#allocation0] sm:$0xf] %vm90_vm8, %v89_v30  }
  0x8a   :  { %93 = vst.msk [vmem:[#allocation0 + $0x4] sm:$0xf0] %vm90_vm8, %v89_v30  }
  0x90   :  { %v96_v31 = vld [vmem:[#allocation0] sm:$0xf] }
  0x91   :  { %99 = vst [vmem:[%s208_s1] sm:$0xf] %v96_v31  ;;  %v101_v32 = vld [vmem:[#allocation0 + $0x8] sm:$0xf] }
  0x92   :  { %120 = vst [vmem:[%s208_s1 + $0x4] sm:$0xf] %v101_v32 }

// kernel: wgb_forward.6
= control target key start
LH: loop header
LB: loop body
LE: loop exit
PB: predicated region body
PF: predicated region fallthrough
CT: control target
= control target key end

     0   :  { %vm48_vm0 = vcmask 130048   ;;  %vm80_vm1 = vcmask 1040384   ;;  %vm76_vm2 = vcmask 7168   ;;  %vm205_vm11 = vcmask 123904   ;;  %s325_s2 = inlined_call_operand.vmem [shape: f32[16,1], index: 2, kind: input, shape index: {}]   ;;  %s326_s6 = inlined_call_operand.vmem [shape: f32[16,1], index: 6, kind: input, shape index: {}]   ;;  %s327_s0 = inlined_call_operand.vmem [shape: f32[2,16], index: 0, kind: input, shape index: {}]   ;;  %s328_s1 = inlined_call_operand.vmem [shape: f32[2,16], index: 1, kind: input, shape index: {}]   ;;  %s329_s3 = inlined_call_operand.<no memory space> [shape: f32[1,1], index: 3, kind: input, shape index: {}]   ;;  %s330_s5 = inlined_call_operand.vmem [shape: f32[1,16], index: 5, kind: input, shape index: {}]   ;;  %s331_s7 = inlined_call_operand.<no memory space> [shape: f32[1,1], index: 7, kind: input, shape index: {}]   ;;  %s332_s4 = inlined_call_operand.vmem [shape: f32[1,16], index: 4, kind: input, shape index: {}]   ;;  %s333_s8 = inlined_call_operand.vmem [shape: f32[1,16], index: 8, kind: input, shape index: {}]   ;;  %s334_s9 = inlined_call_operand.vmem [shape: f32[1,16], index: 9, kind: input, shape index: {}]   ;;  %s335_s10 = inlined_call_operand.vmem [shape: f32[2,16], index: 10, kind: output, shape index: {}]  }
   0x1   :  { %v41_v0 = vld [vmem:[%s325_s2 + $0x8] sm:$0xff]  ;;  %v40_v2 = vld [vmem:[%s325_s2] sm:$0xff]  ;;  %v15_v3 = vstv %s329_s3  ;;  %v17_v7 = vstv %s331_s7 }
   0x2   :  { %v125_v1 = vld [vmem:[%s326_s6 + $0x8] sm:$0xff]  ;;  %66 = vmatpush.msra.mxu0 %v41_v0  ;;  %v124_v4 = vld [vmem:[%s326_s6] sm:$0xff]  ;;  %16 = vst [vmem:[#allocation2] sm:$0x1] %v15_v3 }
   0x3   :  { %149 = vmatpush.msra.mxu2 %v125_v1  ;;  %v39_v5 = vld [vmem:[%s327_s0] sm:$0x3]  ;;  %18 = vst [vmem:[#allocation3] sm:$0x1] %v17_v7 }
   0x4   :  { %v123_v6 = vld [vmem:[%s328_s1] sm:$0x3]  ;;  %67 = vmatpush.msra.mxu0 %v40_v2 }
   0x5   :  { %150 = vmatpush.msra.mxu2 %v124_v4  ;;  %211 = vmatmul.msk.f32.vlgmr.msra.gmra.mxu0 %vm48_vm0, %v39_v5  ;;  %v43_v8 = vld [vmem:[%s332_s4] sm:$0x1] }
   0x6   :  { %215 = vmatmul.msk.f32.vlgmr.msra.gmra.mxu2 %vm48_vm0, %v123_v6  ;;  %212 = vmatpush.msk.msra.mxu1 %vm80_vm1, %v43_v8  ;;  %v127_v9 = vld [vmem:[%s333_s8] sm:$0x1] }
   0x7   :  { %216 = vmatpush.msk.msra.mxu3 %vm80_vm1, %v127_v9  ;;  %v221_v18 = vld [vmem:[%s330_s5] ss:$0 sm:$0xff] }
   0x8   :  { %v222_v22 = vld [vmem:[%s334_s9] ss:$0 sm:$0xff] }
   0x9   :  { %v219_v10 = vld [vmem:[#allocation2] ss:$0 sm:$0xff] }
   0xa   :  { %v220_v14 = vld [vmem:[#allocation3] ss:$0 sm:$0xff] }
  0x82   :  { %v69_v11 = vpop.f32.mrf.mxu0 }
  0x83   :  { %v70_v12 = vadd.f32 %v219_v10, %v69_v11 }
  0x85   :  { %v72_v13 = vmax.f32 %v70_v12, 0.0 }
  0x87   :  { %213 = vmatmul.msk.f32.vlgmr.msra.gmra.mxu1 %vm76_vm2, %v72_v13 }
  0x89   :  { %v152_v15 = vpop.f32.mrf.mxu2 }
  0x8a   :  { %v153_v16 = vadd.f32 %v220_v14, %v152_v15 }
  0x8c   :  { %v155_v17 = vmax.f32 %v153_v16, 0.0 }
  0x8e   :  { %217 = vmatmul.msk.f32.vlgmr.msra.gmra.mxu3 %vm76_vm2, %v155_v17 }
 0x104   :  { %v101_v19 = vpop.f32.mrf.mxu1 }
 0x105   :  { %v102_v20 = vadd.f32 %v221_v18, %v101_v19 }
 0x107   :  { %v214_v21 = vmul.f32 -1.442695, %v102_v20 }
 0x109   :  { %223 = vpow2.f32 %v214_v21 }
 0x10f   :  { %v224_v23 = vpop.eup %223 }
 0x110   :  { %v107_v24 = vadd.f32 1.0, %v224_v23 }
 0x111   :  { %v182_v25 = vpop.f32.mrf.mxu3 }
 0x112   :  { %v183_v26 = vadd.f32 %v222_v22, %v182_v25  ;;  %225 = vrcp.f32 %v107_v24  ;;  %vm113_vm3 = vweird.f32 %v107_v24  ;;  %v119_v36 = vand.u32 2147483648, %v107_v24 }
 0x113   :  { %v117_v38 = vand.u32 2147483647, %v107_v24 }
 0x114   :  { %v218_v27 = vmul.f32 -1.442695, %v183_v26  ;;  %v120_v43 = vor.u32 1.1754944e-38, %v119_v36 }
 0x115   :  { %vm118_vm7 = vcmp.eq.f32.partialorder %v117_v38, 8.507059e+37 }
 0x116   :  { %227 = vpow2.f32 %v218_v27 }
 0x118   :  { %v226_v28 = vpop.eup %225 }
 0x119   :  { %v109_v30 = vmul.f32 %v226_v28, %v107_v24  ;;  %vm114_vm4 = vweird.f32 %v226_v28 }
 0x11a   :  { %vm115_vm5 = vmor %vm113_vm3, %vm114_vm4 }
 0x11b   :  { %v110_v32 = vsub.f32 1.0, %v109_v30 }
 0x11c   :  { %v228_v29 = vpop.eup %227 }
 0x11d   :  { %v188_v31 = vadd.f32 1.0, %v228_v29  ;;  %v111_v33 = vmul.f32 %v226_v28, %v110_v32 }
 0x11f   :  { %229 = vrcp.f32 %v188_v31  ;;  %v112_v37 = vadd.f32 %v226_v28, %v111_v33  ;;  %v200_v40 = vand.u32 2147483648, %v188_v31  ;;  %v198_v42 = vand.u32 2147483647, %v188_v31 }
 0x120   :  { %vm194_vm8 = vweird.f32 %v188_v31 }
 0x121   :  { %v116_v44 = vsel %vm115_vm5, %v226_v28, %v112_v37  ;;  %v201_v46 = vor.u32 1.1754944e-38, %v200_v40  ;;  %vm199_vm10 = vcmp.eq.f32.partialorder %v198_v42, 8.507059e+37 }
 0x122   :  { %v121_v48 = vsel %vm118_vm7, %v120_v43, %v116_v44 }
 0x125   :  { %v230_v34 = vpop.eup %229 }
 0x126   :  { %v190_v35 = vmul.f32 %v230_v34, %v188_v31  ;;  %vm195_vm6 = vweird.f32 %v230_v34 }
 0x127   :  { %vm196_vm9 = vmor %vm194_vm8, %vm195_vm6 }
 0x128   :  { %v191_v39 = vsub.f32 1.0, %v190_v35 }
 0x12a   :  { %v192_v41 = vmul.f32 %v230_v34, %v191_v39 }
 0x12c   :  { %v193_v45 = vadd.f32 %v230_v34, %v192_v41 }
 0x12e   :  { %v197_v47 = vsel %vm196_vm9, %v230_v34, %v193_v45 }
 0x12f   :  { %v202_v49 = vsel %vm199_vm10, %v201_v46, %v197_v47 }
 0x130   :  { %v204_v50 = vadd.f32 %v202_v49, %v121_v48 }
 0x132   :  { %206 = vst.msk [vmem:[%s335_s10] sm:$0x3] %vm205_vm11, %v204_v50 }

// kernel: wgb_forward.7
= control target key start
LH: loop header
LB: loop body
LE: loop exit
PB: predicated region body
PF: predicated region fallthrough
CT: control target
= control target key end

     0   :  { %s449_s9 = smov 0   ;;  %s451_s10 = smov 0   ;;  %s493_s0 = inlined_call_operand.vmem [shape: f32[2,2,2,8,128], index: 0, kind: input, shape index: {}]   ;;  %s494_s1 = inlined_call_operand.vmem [shape: f32[2,5,128], index: 1, kind: input, shape index: {}]   ;;  %s495_s2 = inlined_call_operand.vmem [shape: f32[2,2,2,8,128], index: 2, kind: output, shape index: {}]  }
   0x1   :  { %s453_s11 = smov 0  }
   0x2 LB: > { %s24_s12 = sadd.s32 1, %s428_s10  ;;  %p357_p0 = scmp.ge.s32.totalorder %s432_s11, 1  ;;  %s432_s11 = sphi %s453_s11, %s12_s11   ;;  %s428_s10 = sphi %s451_s10, %s497_s10   ;;  %s424_s9 = sphi %s449_s9, %s496_s9  }
   0x3   : > { %p26_p1 = scmp.ge.s32.totalorder %s24_s12, 2  ;;  %p140_p2 = scmp.lt.s32.totalorder %s432_s11, 3 }
   0x5   : > { %s499_s12 = smov (%p26_p1, %s24_s12), 0  ;;  %p141_p3 = pnand %p357_p0, %p140_p2 }
   0x6   : > { %p172_p4 = scmp.lt.s32.totalorder (!%p141_p3), %s424_s9, 1 }
   0x7   : > { %144 = sbr.rel (%p141_p3) target bundleno = 48 (0x30), region = 28 }
   0xc   : > { %s501_s9 = smov (!%p172_p4, %s424_s9), 1 }
   0xd   : > { %s371_s13 = sshll.u32 %s501_s9, 5  ;;  %s360_s14 = sshll.u32 %s501_s9, 3 }
   0xe   : > { %s179_s17 = scalar_lea.vmem %s493_s0, %s371_s13  ;;  %s183_s20 = scalar_lea.vmem %s494_s1, %s360_s14 }
   0xf   : > { %v197_v0 = vld [vmem:[%s179_s17] sm:$0xff]  ;;  %v363_v2 = vld [vmem:[%s179_s17 + $0x10] sm:$0xff]  ;;  %v364_v3 = vld [vmem:[%s179_s17 + $0x8] sm:$0xff]  ;;  %s191_s23 = scalar_lea.vmem %s495_s2, %s371_s13 }
  0x10   : > { %v397_v1 = vld [vmem:[%s183_s20] ss:$0 sm:$0xff]  ;;  %v365_v4 = vld [vmem:[%s179_s17 + $0x18] sm:$0xff]  ;;  %v398_v13 = vld [vmem:[%s183_s20 + $0x1] ss:$0 sm:$0xff] }
  0x11   : > { %v199_v5 = vmul.f32 %v397_v1, %v197_v0  ;;  %v202_v6 = vmul.f32 %v397_v1, %v363_v2  ;;  %v205_v7 = vmul.f32 %v397_v1, %v364_v3  ;;  %v208_v8 = vmul.f32 %v397_v1, %v365_v4  ;;  %v399_v14 = vld [vmem:[%s183_s20 + $0x2] ss:$0 sm:$0xff]  ;;  %v400_v15 = vld [vmem:[%s183_s20 + $0x3] ss:$0 sm:$0xff]  ;;  %v401_v20 = vld [vmem:[%s183_s20 + $0x4] ss:$0 sm:$0xff] }
  0x13   : > { %v209_v9 = vadd.f32 %v202_v6, %v199_v5  ;;  %v210_v10 = vadd.f32 %v208_v8, %v205_v7  ;;  %v211_v11 = vsub.f32 %v202_v6, %v199_v5  ;;  %v212_v12 = vsub.f32 %v208_v8, %v205_v7 }
  0x15   : > { %v213_v16 = vadd.f32 %v210_v10, %v209_v9  ;;  %v214_v17 = vsub.f32 %v210_v10, %v209_v9  ;;  %v215_v18 = vadd.f32 %v212_v12, %v211_v11  ;;  %v216_v19 = vsub.f32 %v212_v12, %v211_v11 }
  0x17   : > { %v218_v21 = vmul.f32 %v398_v13, %v213_v16  ;;  %v220_v22 = vmul.f32 %v399_v14, %v214_v17  ;;  %v222_v23 = vmul.f32 %v400_v15, %v215_v18  ;;  %v224_v24 = vmul.f32 %v401_v20, %v216_v19 }
  0x19   : > { %v225_v25 = vsub.f32 %v218_v21, %v220_v22  ;;  %v241_v26 = vadd.f32 %v220_v22, %v218_v21 }
  0x1b   : > { %v226_v27 = vsub.f32 %v225_v25, %v222_v23  ;;  %v233_v28 = vadd.f32 %v225_v25, %v222_v23  ;;  %v242_v29 = vsub.f32 %v241_v26, %v222_v23  ;;  %v250_v30 = vadd.f32 %v241_v26, %v222_v23 }
  0x1d   : > { %v227_v31 = vadd.f32 %v226_v27, %v224_v24  ;;  %v234_v32 = vsub.f32 %v233_v28, %v224_v24  ;;  %v243_v33 = vsub.f32 %v242_v29, %v224_v24  ;;  %v251_v34 = vadd.f32 %v250_v30, %v224_v24 }
  0x1f   : > { %402 = vtanh.f32 %v227_v31 }
  0x20   : > { %404 = vtanh.f32 %v234_v32 }
  0x21   : > { %406 = vtanh.f32 %v243_v33 }
  0x22   : > { %408 = vtanh.f32 %v251_v34 }
  0x25   : > { %v403_v35 = vpop.eup %402 }
  0x26   : > { %v405_v36 = vpop.eup %404  ;;  %v229_v37 = vadd.f32 1.0, %v403_v35 }
  0x27   : > { %v407_v38 = vpop.eup %406  ;;  %v236_v39 = vadd.f32 1.0, %v405_v36 }
  0x28   : > { %v409_v40 = vpop.eup %408  ;;  %v230_v41 = vmul.f32 0.5, %v229_v37  ;;  %v245_v42 = vadd.f32 1.0, %v407_v38 }
  0x29   : > { %v237_v43 = vmul.f32 0.5, %v236_v39  ;;  %v253_v44 = vadd.f32 1.0, %v409_v40 }
  0x2a   : > { %v231_v45 = vmul.f32 %v230_v41, %v199_v5  ;;  %v246_v46 = vmul.f32 0.5, %v245_v42 }
  0x2b   : > { %v238_v47 = vmul.f32 %v237_v43, %v202_v6  ;;  %v254_v48 = vmul.f32 0.5, %v253_v44 }
  0x2c   : > { %232 = vst [vmem:[%s191_s23] sm:$0xff] %v231_v45  ;;  %v247_v49 = vmul.f32 %v246_v46, %v205_v7 }
  0x2d   : > { %366 = vst [vmem:[%s191_s23 + $0x10] sm:$0xff] %v238_v47  ;;  %v255_v50 = vmul.f32 %v254_v48, %v208_v8 }
  0x2e   : > { %367 = vst [vmem:[%s191_s23 + $0x8] sm:$0xff] %v247_v49 }
  0x2f   : > { %368 = vst [vmem:[%s191_s23 + $0x18] sm:$0xff] %v255_v50 }
  0x30 PF: > { %s12_s11 = sadd.s32 1, %s432_s11   ;;  %s496_s9 = smov %s428_s10 }
  0x31   : > { %p9_p5 = scmp.ge.s32.totalorder %s12_s11, 4   ;;  %s497_s10 = smov %s499_s12 }
  0x33   :  { %11 = sbr.rel (!%p9_p5) target bundleno = 2 (0x2), region = 67 }

</bundles_post_ra>
